<compile_context>
chip_gen: v5e
topology: v5e:2x2
jax: 0.10.0
libtpu: 0.0.40
codegen_flags: <defaults>
</compile_context>

<pallas_src>
import jax
import jax.numpy as jnp
import numpy as np
from jax import lax
from jax.experimental import pallas as pl
from jax.experimental.pallas import tpu as pltpu


# ---------------------------------------------------------------------------
# Fused Pallas kernel: whole forward pass, everything VMEM-resident.
# ---------------------------------------------------------------------------
def _fused_forward_kernel(xr_ref, r1_ref, k1_ref, b1_ref,
                          r2_ref, k2_ref, b2_ref,
                          q_ref, g_ref, fb1_ref, w2t_ref, fb2_ref,
                          out_ref):
    f32 = jnp.float32

    def conv_block(x, r_ref, k_ref, b_ref):
        # sum_kh (R_kh @ X) @ K_kh + bias, then ReLU.  Unrolled (3 iterations).
        acc = None
        for kh in range(r_ref.shape[0]):
            rows = jnp.dot(r_ref[kh], x, preferred_element_type=f32)
            term = jnp.dot(rows, k_ref[kh], preferred_element_type=f32)
            acc = term if acc is None else acc + term
        return jnp.maximum(acc + b_ref[...], 0.0)

    x0 = xr_ref[...]                                   # (B*H,   W*Cin)
    y1 = conv_block(x0, r1_ref, k1_ref, b1_ref)        # (B*Ho1, Wo1*32)
    y2 = conv_block(y1, r2_ref, k2_ref, b2_ref)        # (B*Ho2, Wo2*64)

    # fc1: torch .view(B,-1) NCHW flatten is folded into the column-permuted
    # fc1 weights G[h]; Q[h] picks the rows of y2 belonging to output row h.
    acc = None
    for h in range(q_ref.shape[0]):
        rows = jnp.dot(q_ref[h], y2, preferred_element_type=f32)    # (B, Wo2*64)
        term = jnp.dot(rows, g_ref[h], preferred_element_type=f32)  # (B, 128)
        acc = term if acc is None else acc + term
    y3 = jnp.maximum(acc + fb1_ref[...], 0.0)

    # fc2 (final, tiny (B, num_classes) store; kept direct to avoid an extra
    # XLA slice op that padding-to-128 would require).
    out = jnp.dot(y3, w2t_ref[...], preferred_element_type=f32) + fb2_ref[...]
    out_ref[...] = out.astype(out_ref.dtype)


def _full_spec(a):
    nd = a.ndim
    return pl.BlockSpec(tuple(a.shape), lambda i, _nd=nd: (0,) * _nd)


def simple_convnet_forward(x, prep):
    """x: (B, C, H, W) float32 (PyTorch NCHW). prep: output of prepare_params."""
    B, C, H, W = x.shape
    # Only per-forward host glue: NCHW -> channels-last (B*H, W*C) relayout.
    xr = jnp.transpose(x, (0, 2, 3, 1)).reshape(B * H, W * C)
    args = (xr, prep["R1"], prep["K1"], prep["b1"],
            prep["R2"], prep["K2"], prep["b2"],
            prep["Q"], prep["G"], prep["fb1"], prep["w2t"], prep["fb2"])
    num_classes = prep["w2t"].shape[1]
    return pl.pallas_call(
        _fused_forward_kernel,
        out_shape=jax.ShapeDtypeStruct((B, num_classes), jnp.float32),
        grid=(1,),
        in_specs=[_full_spec(a) for a in args],
        out_specs=pl.BlockSpec((B, num_classes), lambda i: (0, 0)),
        compiler_params=pltpu.CompilerParams(
            dimension_semantics=("arbitrary",)),
    )(*args)


# ---------------------------------------------------------------------------
# One-time host-side parameter preparation (NOT in the per-forward hot path).
# ---------------------------------------------------------------------------
def _conv_row_select(B, H, Ho):
    """(3, B*Ho, B*H): 0/1 selectors for kernel row kh (stride 2, pad 1)."""
    R = np.zeros((3, B * Ho, B * H), np.float32)
    for kh in range(3):
        for b in range(B):
            for oh in range(Ho):
                h = 2 * oh + kh - 1
                if 0 <= h < H:
                    R[kh, b * Ho + oh, b * H + h] = 1.0
    return R


def _conv_col_weight(weight, W, Wo):
    """(3, W*Cin, Wo*Cout): K[kh] folds W-direction shift/stride/pad + channel mix."""
    weight = np.asarray(weight, np.float32)      # (Cout, Cin, 3, 3)
    Cout, Cin = weight.shape[0], weight.shape[1]
    K = np.zeros((3, W * Cin, Wo * Cout), np.float32)
    for kh in range(3):
        for ow in range(Wo):
            for kw in range(3):
                w = 2 * ow + kw - 1
                if 0 <= w < W:
                    K[kh, w * Cin:(w + 1) * Cin, ow * Cout:(ow + 1) * Cout] += \
                        weight[:, :, kh, kw].T
    return K


def prepare_params(params, image_size, batch):
    """Prep all matrices once: selection matrices, banded conv weights,
    fc1 column permutation, fc weight transposes, bias rows."""
    in_channels, width, height = image_size
    H1, W1 = height, width
    Ho1, Wo1 = (H1 + 1) // 2, (W1 + 1) // 2          # conv1 output spatial
    Ho2, Wo2 = (Ho1 + 1) // 2, (Wo1 + 1) // 2        # conv2 output spatial
    c1o = params["conv1_w"].shape[0]                  # 32
    c2o = params["conv2_w"].shape[0]                  # 64
    n_hidden = params["fc1_w"].shape[0]               # 128

    # fc1 column permutation: G[h, w*C + co, o] = fc1_w[o, co*Ho2*Wo2 + h*Wo2 + w]
    fc1_w = np.asarray(params["fc1_w"], np.float32)
    G = (fc1_w.reshape(n_hidden, c2o, Ho2, Wo2)
             .transpose(2, 3, 1, 0)
             .reshape(Ho2, Wo2 * c2o, n_hidden))

    Q = np.zeros((Ho2, batch, batch * Ho2), np.float32)
    for h in range(Ho2):
        for b in range(batch):
            Q[h, b, b * Ho2 + h] = 1.0

    return {
        "R1": jnp.asarray(_conv_row_select(batch, H1, Ho1)),
        "K1": jnp.asarray(_conv_col_weight(params["conv1_w"], W1, Wo1)),
        "b1": jnp.tile(params["conv1_b"], Wo1).reshape(1, Wo1 * c1o),
        "R2": jnp.asarray(_conv_row_select(batch, Ho1, Ho2)),
        "K2": jnp.asarray(_conv_col_weight(params["conv2_w"], Wo1, Wo2)),
        "b2": jnp.tile(params["conv2_b"], Wo2).reshape(1, Wo2 * c2o),
        "Q": jnp.asarray(Q),
        "G": jnp.asarray(G),
        "fb1": params["fc1_b"].reshape(1, -1),
        "w2t": params["fc2_w"].T,                    # one-time transpose
        "fb2": params["fc2_b"].reshape(1, -1),
    }


# ---------------------------------------------------------------------------
# Params + pure-JAX reference (XLA conv) for validation.
# ---------------------------------------------------------------------------
def make_params(key, in_channels, width, height, num_classes):
    ks = jax.random.split(key, 8)
    flat = 64 * width * height // 16
    scale = 0.1
    return {
        "conv1_w": scale * jax.random.normal(ks[0], (32, in_channels, 3, 3), jnp.float32),
        "conv1_b": scale * jax.random.normal(ks[1], (32,), jnp.float32),
        "conv2_w": scale * jax.random.normal(ks[2], (64, 32, 3, 3), jnp.float32),
        "conv2_b": scale * jax.random.normal(ks[3], (64,), jnp.float32),
        "fc1_w": scale * jax.random.normal(ks[4], (128, flat), jnp.float32),
        "fc1_b": scale * jax.random.normal(ks[5], (128,), jnp.float32),
        "fc2_w": scale * jax.random.normal(ks[6], (num_classes, 128), jnp.float32),
        "fc2_b": scale * jax.random.normal(ks[7], (num_classes,), jnp.float32),
    }


def reference_forward(x, params):
    def conv(x, w, b):
        y = lax.conv_general_dilated(
            x, w, window_strides=(2, 2), padding=((1, 1), (1, 1)),
            dimension_numbers=("NCHW", "OIHW", "NCHW"))
        return y + b.reshape(1, -1, 1, 1)

    x = jnp.maximum(conv(x, params["conv1_w"], params["conv1_b"]), 0.0)
    x = jnp.maximum(conv(x, params["conv2_w"], params["conv2_b"]), 0.0)
    x = x.reshape(x.shape[0], -1)
    x = jnp.maximum(x @ params["fc1_w"].T + params["fc1_b"], 0.0)
    x = x @ params["fc2_w"].T + params["fc2_b"]
    return x


if __name__ == "__main__":
    # image_size = (in_channels, width, height) = (4, 16, 16), num_classes = 10
    in_channels, width, height = 4, 16, 16
    num_classes = 10
    batch = 2

    key = jax.random.PRNGKey(0)
    k_x, k_p = jax.random.split(key)
    x = jax.random.normal(k_x, (batch, in_channels, height, width), jnp.float32)
    params = make_params(k_p, in_channels, width, height, num_classes)

    prep = prepare_params(params, (in_channels, width, height), batch)
    fwd = jax.jit(simple_convnet_forward)

    out = jax.block_until_ready(fwd(x, prep))
    ref = jax.block_until_ready(reference_forward(x, params))

    assert out.shape == (batch, num_classes), out.shape
    assert jnp.allclose(out, ref, rtol=1e-3, atol=1e-3), "mismatch vs reference"

    print("KERNEL_OK")
</pallas_src>

<mosaic_0001>
module attributes {stable_mosaic.version = 11 : i64} {
  func.func @_fused_forward_kernel(%arg0: i32, %arg1: memref<32x64xf32, #tpu.memory_space<vmem>>, %arg2: memref<3x16x32xf32, #tpu.memory_space<vmem>>, %arg3: memref<3x64x256xf32, #tpu.memory_space<vmem>>, %arg4: memref<1x256xf32, #tpu.memory_space<vmem>>, %arg5: memref<3x8x16xf32, #tpu.memory_space<vmem>>, %arg6: memref<3x256x256xf32, #tpu.memory_space<vmem>>, %arg7: memref<1x256xf32, #tpu.memory_space<vmem>>, %arg8: memref<4x2x8xf32, #tpu.memory_space<vmem>>, %arg9: memref<4x256x128xf32, #tpu.memory_space<vmem>>, %arg10: memref<1x128xf32, #tpu.memory_space<vmem>>, %arg11: memref<128x10xf32, #tpu.memory_space<vmem>>, %arg12: memref<1x10xf32, #tpu.memory_space<vmem>>, %arg13: memref<2x10xf32, #tpu.memory_space<vmem>>) attributes {dimension_semantics = [#tpu.dimension_semantics<arbitrary>], iteration_bounds = array<i64: 1>, scalar_prefetch = 0 : i64, scratch_operands = 0 : i64, tpu.core_type = #tpu.core_type<tc>, window_params = [{pipeline_mode = #tpu.pipeline_mode<synchronous>, transform_indices = @transform_0, window_bounds = array<i64: 32, 64>}, {pipeline_mode = #tpu.pipeline_mode<synchronous>, transform_indices = @transform_1, window_bounds = array<i64: 3, 16, 32>}, {pipeline_mode = #tpu.pipeline_mode<synchronous>, transform_indices = @transform_2, window_bounds = array<i64: 3, 64, 256>}, {pipeline_mode = #tpu.pipeline_mode<synchronous>, transform_indices = @transform_3, window_bounds = array<i64: 1, 256>}, {pipeline_mode = #tpu.pipeline_mode<synchronous>, transform_indices = @transform_4, window_bounds = array<i64: 3, 8, 16>}, {pipeline_mode = #tpu.pipeline_mode<synchronous>, transform_indices = @transform_5, window_bounds = array<i64: 3, 256, 256>}, {pipeline_mode = #tpu.pipeline_mode<synchronous>, transform_indices = @transform_6, window_bounds = array<i64: 1, 256>}, {pipeline_mode = #tpu.pipeline_mode<synchronous>, transform_indices = @transform_7, window_bounds = array<i64: 4, 2, 8>}, {pipeline_mode = #tpu.pipeline_mode<synchronous>, transform_indices = @transform_8, window_bounds = array<i64: 4, 256, 128>}, {pipeline_mode = #tpu.pipeline_mode<synchronous>, transform_indices = @transform_9, window_bounds = array<i64: 1, 128>}, {pipeline_mode = #tpu.pipeline_mode<synchronous>, transform_indices = @transform_10, window_bounds = array<i64: 128, 10>}, {pipeline_mode = #tpu.pipeline_mode<synchronous>, transform_indices = @transform_11, window_bounds = array<i64: 1, 10>}, {pipeline_mode = #tpu.pipeline_mode<synchronous>, transform_indices = @transform_12, window_bounds = array<i64: 2, 10>}]} {
    %c0 = arith.constant 0 : index
    %c0_0 = arith.constant 0 : index
    %0 = vector.load %arg1[%c0, %c0_0] : memref<32x64xf32, #tpu.memory_space<vmem>>, vector<32x64xf32>
    %c0_1 = arith.constant 0 : index
    %c0_2 = arith.constant 0 : index
    %c0_3 = arith.constant 0 : index
    %1 = vector.load %arg2[%c0_1, %c0_2, %c0_3] : memref<3x16x32xf32, #tpu.memory_space<vmem>>, vector<1x16x32xf32>
    %2 = vector.shape_cast %1 : vector<1x16x32xf32> to vector<16x32xf32>
    %cst = arith.constant dense<0.000000e+00> : vector<16x64xf32>
    %3 = tpu.matmul %2, %0, %cst {dimension_numbers = #tpu.dot_dimension_numbers<[1], [0], [0], [1], [0, 0, 1, 1], [], []>} : vector<16x32xf32>, vector<32x64xf32>, vector<16x64xf32> -> vector<16x64xf32>
    %c0_4 = arith.constant 0 : index
    %c0_5 = arith.constant 0 : index
    %c0_6 = arith.constant 0 : index
    %4 = vector.load %arg3[%c0_4, %c0_5, %c0_6] : memref<3x64x256xf32, #tpu.memory_space<vmem>>, vector<1x64x256xf32>
    %5 = vector.shape_cast %4 : vector<1x64x256xf32> to vector<64x256xf32>
    %cst_7 = arith.constant dense<0.000000e+00> : vector<16x256xf32>
    %6 = tpu.matmul %3, %5, %cst_7 {dimension_numbers = #tpu.dot_dimension_numbers<[1], [0], [0], [1], [0, 0, 1, 1], [], []>} : vector<16x64xf32>, vector<64x256xf32>, vector<16x256xf32> -> vector<16x256xf32>
    %c1 = arith.constant 1 : index
    %c0_8 = arith.constant 0 : index
    %c0_9 = arith.constant 0 : index
    %7 = vector.load %arg2[%c1, %c0_8, %c0_9] : memref<3x16x32xf32, #tpu.memory_space<vmem>>, vector<1x16x32xf32>
    %8 = vector.shape_cast %7 : vector<1x16x32xf32> to vector<16x32xf32>
    %cst_10 = arith.constant dense<0.000000e+00> : vector<16x64xf32>
    %9 = tpu.matmul %8, %0, %cst_10 {dimension_numbers = #tpu.dot_dimension_numbers<[1], [0], [0], [1], [0, 0, 1, 1], [], []>} : vector<16x32xf32>, vector<32x64xf32>, vector<16x64xf32> -> vector<16x64xf32>
    %c1_11 = arith.constant 1 : index
    %c0_12 = arith.constant 0 : index
    %c0_13 = arith.constant 0 : index
    %10 = vector.load %arg3[%c1_11, %c0_12, %c0_13] : memref<3x64x256xf32, #tpu.memory_space<vmem>>, vector<1x64x256xf32>
    %11 = vector.shape_cast %10 : vector<1x64x256xf32> to vector<64x256xf32>
    %cst_14 = arith.constant dense<0.000000e+00> : vector<16x256xf32>
    %12 = tpu.matmul %9, %11, %cst_14 {dimension_numbers = #tpu.dot_dimension_numbers<[1], [0], [0], [1], [0, 0, 1, 1], [], []>} : vector<16x64xf32>, vector<64x256xf32>, vector<16x256xf32> -> vector<16x256xf32>
    %13 = arith.addf %6, %12 : vector<16x256xf32>
    %c2 = arith.constant 2 : index
    %c0_15 = arith.constant 0 : index
    %c0_16 = arith.constant 0 : index
    %14 = vector.load %arg2[%c2, %c0_15, %c0_16] : memref<3x16x32xf32, #tpu.memory_space<vmem>>, vector<1x16x32xf32>
    %15 = vector.shape_cast %14 : vector<1x16x32xf32> to vector<16x32xf32>
    %cst_17 = arith.constant dense<0.000000e+00> : vector<16x64xf32>
    %16 = tpu.matmul %15, %0, %cst_17 {dimension_numbers = #tpu.dot_dimension_numbers<[1], [0], [0], [1], [0, 0, 1, 1], [], []>} : vector<16x32xf32>, vector<32x64xf32>, vector<16x64xf32> -> vector<16x64xf32>
    %c2_18 = arith.constant 2 : index
    %c0_19 = arith.constant 0 : index
    %c0_20 = arith.constant 0 : index
    %17 = vector.load %arg3[%c2_18, %c0_19, %c0_20] : memref<3x64x256xf32, #tpu.memory_space<vmem>>, vector<1x64x256xf32>
    %18 = vector.shape_cast %17 : vector<1x64x256xf32> to vector<64x256xf32>
    %cst_21 = arith.constant dense<0.000000e+00> : vector<16x256xf32>
    %19 = tpu.matmul %16, %18, %cst_21 {dimension_numbers = #tpu.dot_dimension_numbers<[1], [0], [0], [1], [0, 0, 1, 1], [], []>} : vector<16x64xf32>, vector<64x256xf32>, vector<16x256xf32> -> vector<16x256xf32>
    %20 = arith.addf %13, %19 : vector<16x256xf32>
    %c0_22 = arith.constant 0 : index
    %c0_23 = arith.constant 0 : index
    %21 = vector.load %arg4[%c0_22, %c0_23] : memref<1x256xf32, #tpu.memory_space<vmem>>, vector<1x256xf32>
    %22 = vector.broadcast %21 : vector<1x256xf32> to vector<16x256xf32>
    %23 = arith.addf %20, %22 : vector<16x256xf32>
    %cst_24 = arith.constant 0.000000e+00 : f32
    %24 = vector.broadcast %cst_24 : f32 to vector<16x256xf32>
    %25 = arith.maximumf %23, %24 : vector<16x256xf32>
    %c0_25 = arith.constant 0 : index
    %c0_26 = arith.constant 0 : index
    %c0_27 = arith.constant 0 : index
    %26 = vector.load %arg5[%c0_25, %c0_26, %c0_27] : memref<3x8x16xf32, #tpu.memory_space<vmem>>, vector<1x8x16xf32>
    %27 = vector.shape_cast %26 : vector<1x8x16xf32> to vector<8x16xf32>
    %cst_28 = arith.constant dense<0.000000e+00> : vector<8x256xf32>
    %28 = tpu.matmul %27, %25, %cst_28 {dimension_numbers = #tpu.dot_dimension_numbers<[1], [0], [0], [1], [0, 0, 1, 1], [], []>} : vector<8x16xf32>, vector<16x256xf32>, vector<8x256xf32> -> vector<8x256xf32>
    %c0_29 = arith.constant 0 : index
    %c0_30 = arith.constant 0 : index
    %c0_31 = arith.constant 0 : index
    %29 = vector.load %arg6[%c0_29, %c0_30, %c0_31] : memref<3x256x256xf32, #tpu.memory_space<vmem>>, vector<1x256x256xf32>
    %30 = vector.shape_cast %29 : vector<1x256x256xf32> to vector<256x256xf32>
    %cst_32 = arith.constant dense<0.000000e+00> : vector<8x256xf32>
    %31 = tpu.matmul %28, %30, %cst_32 {dimension_numbers = #tpu.dot_dimension_numbers<[1], [0], [0], [1], [0, 0, 1, 1], [], []>} : vector<8x256xf32>, vector<256x256xf32>, vector<8x256xf32> -> vector<8x256xf32>
    %c1_33 = arith.constant 1 : index
    %c0_34 = arith.constant 0 : index
    %c0_35 = arith.constant 0 : index
    %32 = vector.load %arg5[%c1_33, %c0_34, %c0_35] : memref<3x8x16xf32, #tpu.memory_space<vmem>>, vector<1x8x16xf32>
    %33 = vector.shape_cast %32 : vector<1x8x16xf32> to vector<8x16xf32>
    %cst_36 = arith.constant dense<0.000000e+00> : vector<8x256xf32>
    %34 = tpu.matmul %33, %25, %cst_36 {dimension_numbers = #tpu.dot_dimension_numbers<[1], [0], [0], [1], [0, 0, 1, 1], [], []>} : vector<8x16xf32>, vector<16x256xf32>, vector<8x256xf32> -> vector<8x256xf32>
    %c1_37 = arith.constant 1 : index
    %c0_38 = arith.constant 0 : index
    %c0_39 = arith.constant 0 : index
    %35 = vector.load %arg6[%c1_37, %c0_38, %c0_39] : memref<3x256x256xf32, #tpu.memory_space<vmem>>, vector<1x256x256xf32>
    %36 = vector.shape_cast %35 : vector<1x256x256xf32> to vector<256x256xf32>
    %cst_40 = arith.constant dense<0.000000e+00> : vector<8x256xf32>
    %37 = tpu.matmul %34, %36, %cst_40 {dimension_numbers = #tpu.dot_dimension_numbers<[1], [0], [0], [1], [0, 0, 1, 1], [], []>} : vector<8x256xf32>, vector<256x256xf32>, vector<8x256xf32> -> vector<8x256xf32>
    %38 = arith.addf %31, %37 : vector<8x256xf32>
    %c2_41 = arith.constant 2 : index
    %c0_42 = arith.constant 0 : index
    %c0_43 = arith.constant 0 : index
    %39 = vector.load %arg5[%c2_41, %c0_42, %c0_43] : memref<3x8x16xf32, #tpu.memory_space<vmem>>, vector<1x8x16xf32>
    %40 = vector.shape_cast %39 : vector<1x8x16xf32> to vector<8x16xf32>
    %cst_44 = arith.constant dense<0.000000e+00> : vector<8x256xf32>
    %41 = tpu.matmul %40, %25, %cst_44 {dimension_numbers = #tpu.dot_dimension_numbers<[1], [0], [0], [1], [0, 0, 1, 1], [], []>} : vector<8x16xf32>, vector<16x256xf32>, vector<8x256xf32> -> vector<8x256xf32>
    %c2_45 = arith.constant 2 : index
    %c0_46 = arith.constant 0 : index
    %c0_47 = arith.constant 0 : index
    %42 = vector.load %arg6[%c2_45, %c0_46, %c0_47] : memref<3x256x256xf32, #tpu.memory_space<vmem>>, vector<1x256x256xf32>
    %43 = vector.shape_cast %42 : vector<1x256x256xf32> to vector<256x256xf32>
    %cst_48 = arith.constant dense<0.000000e+00> : vector<8x256xf32>
    %44 = tpu.matmul %41, %43, %cst_48 {dimension_numbers = #tpu.dot_dimension_numbers<[1], [0], [0], [1], [0, 0, 1, 1], [], []>} : vector<8x256xf32>, vector<256x256xf32>, vector<8x256xf32> -> vector<8x256xf32>
    %45 = arith.addf %38, %44 : vector<8x256xf32>
    %c0_49 = arith.constant 0 : index
    %c0_50 = arith.constant 0 : index
    %46 = vector.load %arg7[%c0_49, %c0_50] : memref<1x256xf32, #tpu.memory_space<vmem>>, vector<1x256xf32>
    %47 = vector.broadcast %46 : vector<1x256xf32> to vector<8x256xf32>
    %48 = arith.addf %45, %47 : vector<8x256xf32>
    %cst_51 = arith.constant 0.000000e+00 : f32
    %49 = vector.broadcast %cst_51 : f32 to vector<8x256xf32>
    %50 = arith.maximumf %48, %49 : vector<8x256xf32>
    %c0_52 = arith.constant 0 : index
    %c0_53 = arith.constant 0 : index
    %c0_54 = arith.constant 0 : index
    %51 = vector.load %arg8[%c0_52, %c0_53, %c0_54] : memref<4x2x8xf32, #tpu.memory_space<vmem>>, vector<1x2x8xf32>
    %52 = vector.shape_cast %51 : vector<1x2x8xf32> to vector<2x8xf32>
    %cst_55 = arith.constant dense<0.000000e+00> : vector<2x256xf32>
    %53 = tpu.matmul %52, %50, %cst_55 {dimension_numbers = #tpu.dot_dimension_numbers<[1], [0], [0], [1], [0, 0, 1, 1], [], []>} : vector<2x8xf32>, vector<8x256xf32>, vector<2x256xf32> -> vector<2x256xf32>
    %c0_56 = arith.constant 0 : index
    %c0_57 = arith.constant 0 : index
    %c0_58 = arith.constant 0 : index
    %54 = vector.load %arg9[%c0_56, %c0_57, %c0_58] : memref<4x256x128xf32, #tpu.memory_space<vmem>>, vector<1x256x128xf32>
    %55 = vector.shape_cast %54 : vector<1x256x128xf32> to vector<256x128xf32>
    %cst_59 = arith.constant dense<0.000000e+00> : vector<2x128xf32>
    %56 = tpu.matmul %53, %55, %cst_59 {dimension_numbers = #tpu.dot_dimension_numbers<[1], [0], [0], [1], [0, 0, 1, 1], [], []>} : vector<2x256xf32>, vector<256x128xf32>, vector<2x128xf32> -> vector<2x128xf32>
    %c1_60 = arith.constant 1 : index
    %c0_61 = arith.constant 0 : index
    %c0_62 = arith.constant 0 : index
    %57 = vector.load %arg8[%c1_60, %c0_61, %c0_62] : memref<4x2x8xf32, #tpu.memory_space<vmem>>, vector<1x2x8xf32>
    %58 = vector.shape_cast %57 : vector<1x2x8xf32> to vector<2x8xf32>
    %cst_63 = arith.constant dense<0.000000e+00> : vector<2x256xf32>
    %59 = tpu.matmul %58, %50, %cst_63 {dimension_numbers = #tpu.dot_dimension_numbers<[1], [0], [0], [1], [0, 0, 1, 1], [], []>} : vector<2x8xf32>, vector<8x256xf32>, vector<2x256xf32> -> vector<2x256xf32>
    %c1_64 = arith.constant 1 : index
    %c0_65 = arith.constant 0 : index
    %c0_66 = arith.constant 0 : index
    %60 = vector.load %arg9[%c1_64, %c0_65, %c0_66] : memref<4x256x128xf32, #tpu.memory_space<vmem>>, vector<1x256x128xf32>
    %61 = vector.shape_cast %60 : vector<1x256x128xf32> to vector<256x128xf32>
    %cst_67 = arith.constant dense<0.000000e+00> : vector<2x128xf32>
    %62 = tpu.matmul %59, %61, %cst_67 {dimension_numbers = #tpu.dot_dimension_numbers<[1], [0], [0], [1], [0, 0, 1, 1], [], []>} : vector<2x256xf32>, vector<256x128xf32>, vector<2x128xf32> -> vector<2x128xf32>
    %63 = arith.addf %56, %62 : vector<2x128xf32>
    %c2_68 = arith.constant 2 : index
    %c0_69 = arith.constant 0 : index
    %c0_70 = arith.constant 0 : index
    %64 = vector.load %arg8[%c2_68, %c0_69, %c0_70] : memref<4x2x8xf32, #tpu.memory_space<vmem>>, vector<1x2x8xf32>
    %65 = vector.shape_cast %64 : vector<1x2x8xf32> to vector<2x8xf32>
    %cst_71 = arith.constant dense<0.000000e+00> : vector<2x256xf32>
    %66 = tpu.matmul %65, %50, %cst_71 {dimension_numbers = #tpu.dot_dimension_numbers<[1], [0], [0], [1], [0, 0, 1, 1], [], []>} : vector<2x8xf32>, vector<8x256xf32>, vector<2x256xf32> -> vector<2x256xf32>
    %c2_72 = arith.constant 2 : index
    %c0_73 = arith.constant 0 : index
    %c0_74 = arith.constant 0 : index
    %67 = vector.load %arg9[%c2_72, %c0_73, %c0_74] : memref<4x256x128xf32, #tpu.memory_space<vmem>>, vector<1x256x128xf32>
    %68 = vector.shape_cast %67 : vector<1x256x128xf32> to vector<256x128xf32>
    %cst_75 = arith.constant dense<0.000000e+00> : vector<2x128xf32>
    %69 = tpu.matmul %66, %68, %cst_75 {dimension_numbers = #tpu.dot_dimension_numbers<[1], [0], [0], [1], [0, 0, 1, 1], [], []>} : vector<2x256xf32>, vector<256x128xf32>, vector<2x128xf32> -> vector<2x128xf32>
    %70 = arith.addf %63, %69 : vector<2x128xf32>
    %c3 = arith.constant 3 : index
    %c0_76 = arith.constant 0 : index
    %c0_77 = arith.constant 0 : index
    %71 = vector.load %arg8[%c3, %c0_76, %c0_77] : memref<4x2x8xf32, #tpu.memory_space<vmem>>, vector<1x2x8xf32>
    %72 = vector.shape_cast %71 : vector<1x2x8xf32> to vector<2x8xf32>
    %cst_78 = arith.constant dense<0.000000e+00> : vector<2x256xf32>
    %73 = tpu.matmul %72, %50, %cst_78 {dimension_numbers = #tpu.dot_dimension_numbers<[1], [0], [0], [1], [0, 0, 1, 1], [], []>} : vector<2x8xf32>, vector<8x256xf32>, vector<2x256xf32> -> vector<2x256xf32>
    %c3_79 = arith.constant 3 : index
    %c0_80 = arith.constant 0 : index
    %c0_81 = arith.constant 0 : index
    %74 = vector.load %arg9[%c3_79, %c0_80, %c0_81] : memref<4x256x128xf32, #tpu.memory_space<vmem>>, vector<1x256x128xf32>
    %75 = vector.shape_cast %74 : vector<1x256x128xf32> to vector<256x128xf32>
    %cst_82 = arith.constant dense<0.000000e+00> : vector<2x128xf32>
    %76 = tpu.matmul %73, %75, %cst_82 {dimension_numbers = #tpu.dot_dimension_numbers<[1], [0], [0], [1], [0, 0, 1, 1], [], []>} : vector<2x256xf32>, vector<256x128xf32>, vector<2x128xf32> -> vector<2x128xf32>
    %77 = arith.addf %70, %76 : vector<2x128xf32>
    %c0_83 = arith.constant 0 : index
    %c0_84 = arith.constant 0 : index
    %78 = vector.load %arg10[%c0_83, %c0_84] : memref<1x128xf32, #tpu.memory_space<vmem>>, vector<1x128xf32>
    %79 = vector.broadcast %78 : vector<1x128xf32> to vector<2x128xf32>
    %80 = arith.addf %77, %79 : vector<2x128xf32>
    %cst_85 = arith.constant 0.000000e+00 : f32
    %81 = vector.broadcast %cst_85 : f32 to vector<2x128xf32>
    %82 = arith.maximumf %80, %81 : vector<2x128xf32>
    %c0_86 = arith.constant 0 : index
    %c0_87 = arith.constant 0 : index
    %83 = vector.load %arg11[%c0_86, %c0_87] : memref<128x10xf32, #tpu.memory_space<vmem>>, vector<128x10xf32>
    %cst_88 = arith.constant dense<0.000000e+00> : vector<2x10xf32>
    %84 = tpu.matmul %82, %83, %cst_88 {dimension_numbers = #tpu.dot_dimension_numbers<[1], [0], [0], [1], [0, 0, 1, 1], [], []>} : vector<2x128xf32>, vector<128x10xf32>, vector<2x10xf32> -> vector<2x10xf32>
    %c0_89 = arith.constant 0 : index
    %c0_90 = arith.constant 0 : index
    %85 = vector.load %arg12[%c0_89, %c0_90] : memref<1x10xf32, #tpu.memory_space<vmem>>, vector<1x10xf32>
    %86 = vector.broadcast %85 : vector<1x10xf32> to vector<2x10xf32>
    %87 = arith.addf %84, %86 : vector<2x10xf32>
    %c0_91 = arith.constant 0 : index
    %c0_92 = arith.constant 0 : index
    %88 = vector.load %arg13[%c0_91, %c0_92] : memref<2x10xf32, #tpu.memory_space<vmem>>, vector<2x10xf32>
    tpu.vector_store %arg13[%c0_91, %c0_92], %87 {strides = array<i32>} : memref<2x10xf32, #tpu.memory_space<vmem>>, vector<2x10xf32>,
    return
  }
  func.func @transform_0(%arg0: i32) -> (i32, i32) {
    %c0_i32 = arith.constant 0 : i32
    %c0_i32_0 = arith.constant 0 : i32
    %c0_i32_1 = arith.constant 0 : i32
    return %c0_i32, %c0_i32_0 : i32, i32
  }
  func.func @transform_1(%arg0: i32) -> (i32, i32, i32) {
    %c0_i32 = arith.constant 0 : i32
    %c0_i32_0 = arith.constant 0 : i32
    %c0_i32_1 = arith.constant 0 : i32
    %c0_i32_2 = arith.constant 0 : i32
    return %c0_i32, %c0_i32_0, %c0_i32_1 : i32, i32, i32
  }
  func.func @transform_2(%arg0: i32) -> (i32, i32, i32) {
    %c0_i32 = arith.constant 0 : i32
    %c0_i32_0 = arith.constant 0 : i32
    %c0_i32_1 = arith.constant 0 : i32
    %c0_i32_2 = arith.constant 0 : i32
    return %c0_i32, %c0_i32_0, %c0_i32_1 : i32, i32, i32
  }
  func.func @transform_3(%arg0: i32) -> (i32, i32) {
    %c0_i32 = arith.constant 0 : i32
    %c0_i32_0 = arith.constant 0 : i32
    %c0_i32_1 = arith.constant 0 : i32
    return %c0_i32, %c0_i32_0 : i32, i32
  }
  func.func @transform_4(%arg0: i32) -> (i32, i32, i32) {
    %c0_i32 = arith.constant 0 : i32
    %c0_i32_0 = arith.constant 0 : i32
    %c0_i32_1 = arith.constant 0 : i32
    %c0_i32_2 = arith.constant 0 : i32
    return %c0_i32, %c0_i32_0, %c0_i32_1 : i32, i32, i32
  }
  func.func @transform_5(%arg0: i32) -> (i32, i32, i32) {
    %c0_i32 = arith.constant 0 : i32
    %c0_i32_0 = arith.constant 0 : i32
    %c0_i32_1 = arith.constant 0 : i32
    %c0_i32_2 = arith.constant 0 : i32
    return %c0_i32, %c0_i32_0, %c0_i32_1 : i32, i32, i32
  }
  func.func @transform_6(%arg0: i32) -> (i32, i32) {
    %c0_i32 = arith.constant 0 : i32
    %c0_i32_0 = arith.constant 0 : i32
    %c0_i32_1 = arith.constant 0 : i32
    return %c0_i32, %c0_i32_0 : i32, i32
  }
  func.func @transform_7(%arg0: i32) -> (i32, i32, i32) {
    %c0_i32 = arith.constant 0 : i32
    %c0_i32_0 = arith.constant 0 : i32
    %c0_i32_1 = arith.constant 0 : i32
    %c0_i32_2 = arith.constant 0 : i32
    return %c0_i32, %c0_i32_0, %c0_i32_1 : i32, i32, i32
  }
  func.func @transform_8(%arg0: i32) -> (i32, i32, i32) {
    %c0_i32 = arith.constant 0 : i32
    %c0_i32_0 = arith.constant 0 : i32
    %c0_i32_1 = arith.constant 0 : i32
    %c0_i32_2 = arith.constant 0 : i32
    return %c0_i32, %c0_i32_0, %c0_i32_1 : i32, i32, i32
  }
  func.func @transform_9(%arg0: i32) -> (i32, i32) {
    %c0_i32 = arith.constant 0 : i32
    %c0_i32_0 = arith.constant 0 : i32
    %c0_i32_1 = arith.constant 0 : i32
    return %c0_i32, %c0_i32_0 : i32, i32
  }
  func.func @transform_10(%arg0: i32) -> (i32, i32) {
    %c0_i32 = arith.constant 0 : i32
    %c0_i32_0 = arith.constant 0 : i32
    %c0_i32_1 = arith.constant 0 : i32
    return %c0_i32, %c0_i32_0 : i32, i32
  }
  func.func @transform_11(%arg0: i32) -> (i32, i32) {
    %c0_i32 = arith.constant 0 : i32
    %c0_i32_0 = arith.constant 0 : i32
    %c0_i32_1 = arith.constant 0 : i32
    return %c0_i32, %c0_i32_0 : i32, i32
  }
  func.func @transform_12(%arg0: i32) -> (i32, i32) {
    %c0_i32 = arith.constant 0 : i32
    %c0_i32_0 = arith.constant 0 : i32
    %c0_i32_1 = arith.constant 0 : i32
    return %c0_i32, %c0_i32_0 : i32, i32
  }
}

</mosaic_0001>

<bundles_post_ra>
// kernel: simple_convnet_forward.1
= control target key start
LH: loop header
LB: loop body
LE: loop exit
PB: predicated region body
PF: predicated region fallthrough
CT: control target
= control target key end

     0   :  { %17 = vsyncpa [#allocation3], 0  ;;  %s2099_s0 = inlined_call_operand.vmem [shape: f32[32,64], index: 0, kind: input, shape index: {}]   ;;  %s2100_s1 = inlined_call_operand.vmem [shape: f32[3,16,32], index: 1, kind: input, shape index: {}]   ;;  %s2101_s2 = inlined_call_operand.vmem [shape: f32[3,64,256], index: 2, kind: input, shape index: {}]   ;;  %s2102_s3 = inlined_call_operand.vmem [shape: f32[1,256], index: 3, kind: input, shape index: {}]   ;;  %s2103_s4 = inlined_call_operand.vmem [shape: f32[3,8,16], index: 4, kind: input, shape index: {}]   ;;  %s2104_s5 = inlined_call_operand.hbm [shape: f32[3,256,256], index: 5, kind: input, shape index: {}]   ;;  %s2105_s6 = inlined_call_operand.vmem [shape: f32[1,256], index: 6, kind: input, shape index: {}]   ;;  %s2106_s7 = inlined_call_operand.vmem [shape: f32[4,2,8], index: 7, kind: input, shape index: {}]   ;;  %s2107_s8 = inlined_call_operand.hbm [shape: f32[4,256,128], index: 8, kind: input, shape index: {}]   ;;  %s2108_s9 = inlined_call_operand.vmem [shape: f32[1,128], index: 9, kind: input, shape index: {}]   ;;  %s2109_s10 = inlined_call_operand.vmem [shape: f32[128,10], index: 10, kind: input, shape index: {}]   ;;  %s2110_s11 = inlined_call_operand.vmem [shape: f32[1,10], index: 11, kind: input, shape index: {}]   ;;  %s2111_s12 = inlined_call_operand.hbm [shape: f32[2,10], index: 12, kind: output, shape index: {}]  }
   0x1   :  { %18 = vsyncpa [#allocation6], 0 }
   0x2   :  { %19 = vsyncpa [#allocation4], 0  ;;  %s34_s23 = sshll.u32 %s2104_s5, 4  ;;  %s1679_s24 = smov [#allocation2]   ;;  %s35_s23 = int_to_ptr.hbm [resolvable:$true] %s34_s23 }
   0x3   :  { %s36_s25 = sshll.u32 %s1679_s24, 4  ;;  %s51_s28 = sshll.u32 %s2107_s8, 4  ;;  %s37_s25 = int_to_ptr.vmem [resolvable:$true] %s36_s25  ;;  %s52_s28 = int_to_ptr.hbm [resolvable:$true] %s51_s28 }
   0x4   :  { %s1680_s29 = smov 256   ;;  %s1681_s30 = smov 16  }
   0x5   :  { %42 = dma.hbm_to_vmem [thread:$0]  %s35_s23, 24576, %s37_s25, [#allocation3], %s1680_s29, %s1680_s29, %s1681_s30  }
   0x6   :  { %s1682_s13 = smov [#allocation5]   ;;  %s1683_s15 = smov 128  }
   0x7   :  { %s53_s14 = sshll.u32 %s1682_s13, 4  ;;  %s1684_s16 = smov 8   ;;  %s54_s14 = int_to_ptr.vmem [resolvable:$true] %s53_s14 }
   0x8   :  { %59 = dma.hbm_to_vmem [thread:$0]  %s52_s28, 16384, %s54_s14, [#allocation6], %s1683_s15, %s1683_s15, %s1684_s16  }
   0x9   :  { %1673 = dma.done.wait [#allocation3], 24576  }
   0xa   :  { %1674 = vsyncadd [#allocation3], 4294942720 }
   0xb   :  { %1675 = dma.done.wait [#allocation6], 16384  }
   0xc   :  { %1676 = vsyncadd [#allocation6], 4294950912  ;;  %v1760_v0 = vld [vmem:[%s2099_s0 + $0x18] sm:$0xff]  ;;  %v1765_v1 = vld [vmem:[%s2099_s0 + $0x10] sm:$0xff]  ;;  %vm80_vm0 = vcmask 261120   ;;  %vm175_vm1 = vcmask 523264  }
   0xd   :  { %99 = vmatpush.msra.mxu0 %v1760_v0  ;;  %147 = vmatpush.msra.mxu1 %v1760_v0  ;;  %v1772_v2 = vld [vmem:[%s2099_s0 + $0x8] sm:$0xff]  ;;  %v1539_v3 = vld [vmem:[%s2101_s2 + $0xf0] sm:$0xff]  ;;  %v1537_v4 = vld [vmem:[%s2101_s2 + $0xe0] sm:$0xff]  ;;  %vm400_vm2 = vcmask 130048   ;;  %vm981_vm3 = vcmask 64512   ;;  %s1685_s23 = smov [#allocation7]  }
   0xe   :  { %v1785_v5 = vld [vmem:[%s2099_s0] sm:$0xff]  ;;  %190 = vmatpush.msra.mxu2 %v1539_v3  ;;  %v1521_v7 = vld [vmem:[%s2100_s1 + $0x10] sm:$0xff]  ;;  %v1540_v8 = vld [vmem:[%s2101_s2 + $0xf8] sm:$0xff]  ;;  %s1508_s25 = sshll.u32 %s2111_s12, 4  ;;  %vm1499_vm4 = vcmask 74752   ;;  %s1509_s25 = int_to_ptr.hbm [resolvable:$true] %s1508_s25 }
   0xf   :  { %100 = vmatpush.msra.mxu0 %v1765_v1  ;;  %148 = vmatpush.msra.mxu1 %v1765_v1  ;;  %v78_v6 = vld [vmem:[%s2100_s1] sm:$0xff]  ;;  %v125_v9 = vld [vmem:[%s2101_s2 + $0x78] sm:$0xff]  ;;  %v1535_v10 = vld [vmem:[%s2101_s2 + $0xd0] sm:$0xff] }
  0x10   :  { %191 = vmatpush.msra.mxu2 %v1537_v4  ;;  %v1538_v11 = vld [vmem:[%s2101_s2 + $0xe8] sm:$0xff]  ;;  %v1533_v13 = vld [vmem:[%s2101_s2 + $0xc0] sm:$0xff]  ;;  %v1536_v14 = vld [vmem:[%s2101_s2 + $0xd8] sm:$0xff] }
  0x11   :  { %101 = vmatpush.msra.mxu0 %v1772_v2  ;;  %149 = vmatpush.msra.mxu1 %v1772_v2  ;;  %v123_v12 = vld [vmem:[%s2101_s2 + $0x68] sm:$0xff]  ;;  %v121_v15 = vld [vmem:[%s2101_s2 + $0x58] sm:$0xff]  ;;  %v1531_v16 = vld [vmem:[%s2101_s2 + $0xb0] sm:$0xff] }
  0x12   :  { %192 = vmatpush.msra.mxu2 %v1535_v10  ;;  %v1534_v17 = vld [vmem:[%s2101_s2 + $0xc8] sm:$0xff]  ;;  %v1522_v20 = vld [vmem:[%s2100_s1 + $0x18] sm:$0xff]  ;;  %v1529_v23 = vld [vmem:[%s2101_s2 + $0xa0] sm:$0xff] }
  0x13   :  { %102 = vmatpush.msra.mxu0 %v1785_v5  ;;  %150 = vmatpush.msra.mxu1 %v1785_v5  ;;  %v119_v18 = vld [vmem:[%s2101_s2 + $0x48] sm:$0xff]  ;;  %v1532_v21 = vld [vmem:[%s2101_s2 + $0xb8] sm:$0xff]  ;;  %v1527_v26 = vld [vmem:[%s2101_s2 + $0x90] sm:$0xff] }
  0x14   :  { %1519 = vmatmul.msk.f32.vlgmr.msra.gmra.mxu0 %vm80_vm0, %v78_v6  ;;  %1523 = vmatmul.msk.f32.vlgmr.msra.gmra.mxu1 %vm80_vm0, %v1521_v7  ;;  %v79_v19 = vld [vmem:[%s2100_s1 + $0x8] sm:$0xff]  ;;  %v117_v22 = vld [vmem:[%s2101_s2 + $0x38] sm:$0xff]  ;;  %v1525_v29 = vld [vmem:[%s2101_s2 + $0x80] sm:$0xff] }
  0x15   :  { %213 = vmatpush.msrb.mxu0 %v1540_v8  ;;  %265 = vmatpush.msrb.mxu1 %v125_v9  ;;  %v1530_v24 = vld [vmem:[%s2101_s2 + $0xa8] sm:$0xff]  ;;  %v1528_v27 = vld [vmem:[%s2101_s2 + $0x98] sm:$0xff]  ;;  %v124_v32 = vld [vmem:[%s2101_s2 + $0x70] sm:$0xff] }
  0x16   :  { %193 = vmatpush.msra.mxu2 %v1533_v13  ;;  %v115_v25 = vld [vmem:[%s2101_s2 + $0x28] sm:$0xff]  ;;  %v113_v28 = vld [vmem:[%s2101_s2 + $0x18] sm:$0xff]  ;;  %v122_v33 = vld [vmem:[%s2101_s2 + $0x60] sm:$0xff] }
  0x17   :  { %214 = vmatpush.msrb.mxu0 %v1538_v11  ;;  %266 = vmatpush.msrb.mxu1 %v123_v12  ;;  %v1526_v30 = vld [vmem:[%s2101_s2 + $0x88] sm:$0xff]  ;;  %v120_v34 = vld [vmem:[%s2101_s2 + $0x50] sm:$0xff]  ;;  %v118_v35 = vld [vmem:[%s2101_s2 + $0x40] sm:$0xff] }
  0x18   :  { %194 = vmatpush.msra.mxu2 %v1531_v16  ;;  %v111_v31 = vld [vmem:[%s2101_s2 + $0x8] sm:$0xff]  ;;  %v116_v36 = vld [vmem:[%s2101_s2 + $0x30] sm:$0xff]  ;;  %v114_v37 = vld [vmem:[%s2101_s2 + $0x20] sm:$0xff] }
  0x19   :  { %215 = vmatpush.msrb.mxu0 %v1536_v14  ;;  %267 = vmatpush.msrb.mxu1 %v121_v15  ;;  %v112_v38 = vld [vmem:[%s2101_s2 + $0x10] sm:$0xff]  ;;  %v110_v39 = vld [vmem:[%s2101_s2] sm:$0xff]  ;;  %v1550_v45 = vld [vmem:[%s2100_s1 + $0x28] sm:$0xff] }
  0x1a   :  { %195 = vmatpush.msra.mxu2 %v1529_v23  ;;  %v1549_v44 = vld [vmem:[%s2100_s1 + $0x20] sm:$0xff]  ;;  %v1567_v46 = vld [vmem:[%s2101_s2 + $0x170] sm:$0xff]  ;;  %v1568_v47 = vld [vmem:[%s2101_s2 + $0x178] sm:$0xff] }
  0x1b   :  { %216 = vmatpush.msrb.mxu0 %v1534_v17  ;;  %268 = vmatpush.msrb.mxu1 %v119_v18  ;;  %v1565_v48 = vld [vmem:[%s2101_s2 + $0x160] sm:$0xff]  ;;  %v1566_v49 = vld [vmem:[%s2101_s2 + $0x168] sm:$0xff]  ;;  %v1563_v50 = vld [vmem:[%s2101_s2 + $0x150] sm:$0xff] }
  0x1c   :  { %1520 = vmatmul.msk.f32.gmra.mxu0 %vm80_vm0, %v79_v19  ;;  %1524 = vmatmul.msk.f32.gmra.mxu1 %vm80_vm0, %v1522_v20  ;;  %v1564_v51 = vld [vmem:[%s2101_s2 + $0x158] sm:$0xff]  ;;  %v1561_v52 = vld [vmem:[%s2101_s2 + $0x140] sm:$0xff]  ;;  %v1562_v53 = vld [vmem:[%s2101_s2 + $0x148] sm:$0xff] }
  0x1d   :  { %217 = vmatpush.msrb.mxu0 %v1532_v21  ;;  %269 = vmatpush.msrb.mxu1 %v117_v22  ;;  %v1559_v54 = vld [vmem:[%s2101_s2 + $0x130] sm:$0xff]  ;;  %v1560_v55 = vld [vmem:[%s2101_s2 + $0x138] sm:$0xff]  ;;  %v1557_v56 = vld [vmem:[%s2101_s2 + $0x120] sm:$0xff] }
  0x1e   :  { %196 = vmatpush.msra.mxu2 %v1527_v26  ;;  %343 = vmatpush.msra.mxu3 %v1567_v46  ;;  %v1558_v57 = vld [vmem:[%s2101_s2 + $0x128] sm:$0xff]  ;;  %v1555_v58 = vld [vmem:[%s2101_s2 + $0x110] sm:$0xff]  ;;  %v1556_v59 = vld [vmem:[%s2101_s2 + $0x118] sm:$0xff] }
  0x1f   :  { %218 = vmatpush.msrb.mxu0 %v1530_v24  ;;  %270 = vmatpush.msrb.mxu1 %v115_v25  ;;  %v1553_v60 = vld [vmem:[%s2101_s2 + $0x100] sm:$0xff]  ;;  %v1554_v61 = vld [vmem:[%s2101_s2 + $0x108] sm:$0xff]  ;;  %v584_v8 = vld [vmem:[#allocation2 + $0x2f0] sm:$0xff]  ;;  %s1506_s2 = sshll.u32 %s1685_s23, 4  ;;  %s1507_s2 = int_to_ptr.vmem [resolvable:$true] %s1506_s2 }
  0x20   :  { %197 = vmatpush.msra.mxu2 %v1525_v29  ;;  %344 = vmatpush.msra.mxu3 %v1565_v48  ;;  %v582_v9 = vld [vmem:[#allocation2 + $0x2e0] sm:$0xff]  ;;  %v580_v10 = vld [vmem:[#allocation2 + $0x2d0] sm:$0xff]  ;;  %v585_v46 = vld [vmem:[#allocation2 + $0x2f8] sm:$0xff] }
  0x21   :  { %219 = vmatpush.msrb.mxu0 %v1528_v27  ;;  %271 = vmatpush.msrb.mxu1 %v113_v28  ;;  %v385_v12 = vld [vmem:[%s2102_s3] sm:$0x3]  ;;  %v576_v19 = vld [vmem:[#allocation2 + $0x2b0] sm:$0xff] }
  0x22   :  { %301 = vmatpush.msrb.mxu2 %v1760_v0  ;;  %345 = vmatpush.msra.mxu3 %v1563_v50  ;;  %v578_v14 = vld [vmem:[#allocation2 + $0x2c0] sm:$0xff]  ;;  %v388_v18 = vperm.slane %v385_v12, 1  ;;  %v572_v26 = vld [vmem:[#allocation2 + $0x290] sm:$0xff]  ;;  %v387_v29 = vperm.slane %v385_v12, 0  ;;  %v611_v50 = vld [vmem:[#allocation2 + $0x3c8] sm:$0xff] }
  0x23   :  { %220 = vmatpush.msrb.mxu0 %v1526_v30  ;;  %272 = vmatpush.msrb.mxu1 %v111_v31  ;;  %v574_v22 = vld [vmem:[#allocation2 + $0x2a0] sm:$0xff]  ;;  %v616_v48 = vld [vmem:[#allocation2 + $0x3f0] sm:$0xff] }
  0x24   :  { %302 = vmatpush.msrb.mxu2 %v1765_v1  ;;  %346 = vmatpush.msra.mxu3 %v1561_v52  ;;  %v570_v31 = vld [vmem:[#allocation2 + $0x280] sm:$0xff] }
  0x25   :  { %242 = vmatpush.msra.mxu0 %v124_v32  ;;  %v614_v52 = vld [vmem:[#allocation2 + $0x3e0] sm:$0xff] }
  0x26   :  { %303 = vmatpush.msrb.mxu2 %v1772_v2  ;;  %347 = vmatpush.msra.mxu3 %v1559_v54  ;;  %v609_v54 = vld [vmem:[#allocation2 + $0x3b8] sm:$0xff]  ;;  %v472_v12 = vld [vmem:[#allocation2 + $0xe0] sm:$0xff] }
  0x27   :  { %243 = vmatpush.msra.mxu0 %v122_v33 }
  0x28   :  { %304 = vmatpush.msrb.mxu2 %v1785_v5  ;;  %348 = vmatpush.msra.mxu3 %v1557_v56  ;;  %v612_v56 = vld [vmem:[#allocation2 + $0x3d0] sm:$0xff] }
  0x29   :  { %244 = vmatpush.msra.mxu0 %v120_v34 }
  0x2a   :  { %349 = vmatpush.msra.mxu3 %v1555_v58  ;;  %v607_v58 = vld [vmem:[#allocation2 + $0x3a8] sm:$0xff] }
  0x2b   :  { %245 = vmatpush.msra.mxu0 %v118_v35  ;;  %v1575_v35 = vld [vmem:[%s2103_s4 + $0x8] sm:$0xff] }
  0x2c   :  { %350 = vmatpush.msra.mxu3 %v1553_v60  ;;  %v577_v60 = vld [vmem:[#allocation2 + $0x2b8] sm:$0xff] }
  0x2d   :  { %246 = vmatpush.msra.mxu0 %v116_v36  ;;  %v568_v36 = vld [vmem:[#allocation2 + $0x270] sm:$0xff] }
  0x2f   :  { %247 = vmatpush.msra.mxu0 %v114_v37  ;;  %v617_v37 = vld [vmem:[#allocation2 + $0x3f8] sm:$0xff] }
  0x31   :  { %248 = vmatpush.msra.mxu0 %v112_v38 }
  0x33   :  { %249 = vmatpush.msra.mxu0 %v110_v39 }
  0x91   :  { %v104_v40 = vpop.f32.mrf.mxu0  ;;  %v152_v41 = vpop.f32.mrf.mxu1 }
  0x92   :  { %1541 = vmatmul.msk.f32.vlgmr.msra.gmra.mxu2 %vm175_vm1, %v152_v41  ;;  %1543 = vmatmul.msk.f32.vlgmr.msrb.gmra.mxu0 %vm175_vm1, %v152_v41 }
  0x93   :  { %1547 = vmatmul.msk.f32.vlgmr.msrb.gmra.mxu1 %vm175_vm1, %v104_v40  ;;  %366 = vmatpush.msrb.mxu0 %v1568_v47  ;;  %v613_v47 = vld [vmem:[#allocation2 + $0x3d8] sm:$0xff] }
  0x95   :  { %367 = vmatpush.msrb.mxu0 %v1566_v49  ;;  %v583_v49 = vld [vmem:[#allocation2 + $0x2e8] sm:$0xff] }
  0x97   :  { %368 = vmatpush.msrb.mxu0 %v1564_v51  ;;  %v562_v51 = vld [vmem:[#allocation2 + $0x240] sm:$0xff] }
  0x99   :  { %v107_v42 = vpop.f32.mrf.mxu0  ;;  %v155_v43 = vpop.f32.mrf.mxu1  ;;  %369 = vmatpush.msrb.mxu0 %v1562_v53  ;;  %v581_v53 = vld [vmem:[#allocation2 + $0x2d8] sm:$0xff] }
  0x9a   :  { %1542 = vmatmul.msk.f32.gmra.mxu2 %vm175_vm1, %v155_v43  ;;  %1544 = vmatmul.msk.f32.gmra.mxu0 %vm175_vm1, %v155_v43  ;;  %v564_v43 = vld [vmem:[#allocation2 + $0x250] sm:$0xff] }
  0x9b   :  { %1548 = vmatmul.msk.f32.gmra.mxu1 %vm175_vm1, %v107_v42  ;;  %370 = vmatpush.msrb.mxu0 %v1560_v55  ;;  %v560_v55 = vld [vmem:[#allocation2 + $0x230] sm:$0xff] }
  0x9d   :  { %371 = vmatpush.msrb.mxu0 %v1558_v57  ;;  %v579_v57 = vld [vmem:[#allocation2 + $0x2c8] sm:$0xff] }
  0x9f   :  { %372 = vmatpush.msrb.mxu0 %v1556_v59  ;;  %v558_v59 = vld [vmem:[#allocation2 + $0x220] sm:$0xff] }
  0xa1   :  { %373 = vmatpush.msrb.mxu0 %v1554_v61  ;;  %v610_v61 = vld [vmem:[#allocation2 + $0x3c0] sm:$0xff] }
  0xa2   :  { %1545 = vmatmul.msk.f32.vlgmr.msra.gmra.mxu0 %vm175_vm1, %v104_v40  ;;  %1551 = vmatmul.msk.f32.vlgmr.msrb.gmra.mxu2 %vm80_vm0, %v1549_v44  ;;  %v566_v40 = vld [vmem:[#allocation2 + $0x260] sm:$0xff] }
  0xa3   :  { %618 = vmatpush.msra.mxu0 %v584_v8  ;;  %v474_v8 = vld [vmem:[#allocation2 + $0xf0] sm:$0xff] }
  0xa5   :  { %619 = vmatpush.msra.mxu0 %v582_v9  ;;  %v604_v9 = vld [vmem:[#allocation2 + $0x390] sm:$0xff] }
  0xa7   :  { %620 = vmatpush.msra.mxu0 %v580_v10  ;;  %v599_v10 = vld [vmem:[#allocation2 + $0x368] sm:$0xff] }
  0xa9   :  { %621 = vmatpush.msra.mxu0 %v578_v14  ;;  %v597_v14 = vld [vmem:[#allocation2 + $0x358] sm:$0xff] }
  0xaa   :  { %1546 = vmatmul.msk.f32.gmra.mxu0 %vm175_vm1, %v107_v42  ;;  %1552 = vmatmul.msk.f32.gmra.mxu2 %vm80_vm0, %v1550_v45  ;;  %v615_v42 = vld [vmem:[#allocation2 + $0x3e8] sm:$0xff]  ;;  %v399_v45 = vld [vmem:[%s2103_s4] sm:$0xff] }
  0xab   :  { %622 = vmatpush.msra.mxu0 %v576_v19  ;;  %v565_v19 = vld [vmem:[#allocation2 + $0x258] sm:$0xff] }
  0xad   :  { %623 = vmatpush.msra.mxu0 %v574_v22  ;;  %v593_v22 = vld [vmem:[#allocation2 + $0x338] sm:$0xff] }
  0xaf   :  { %624 = vmatpush.msra.mxu0 %v572_v26  ;;  %v591_v26 = vld [vmem:[#allocation2 + $0x328] sm:$0xff] }
  0xb1   :  { %625 = vmatpush.msra.mxu0 %v570_v31  ;;  %v589_v31 = vld [vmem:[#allocation2 + $0x318] sm:$0xff] }
  0xb3   :  { %626 = vmatpush.msra.mxu0 %v568_v36  ;;  %v587_v36 = vld [vmem:[#allocation2 + $0x308] sm:$0xff] }
  0xb5   :  { %627 = vmatpush.msra.mxu0 %v566_v40  ;;  %v460_v40 = vld [vmem:[#allocation2 + $0x80] sm:$0xff] }
  0xb7   :  { %628 = vmatpush.msra.mxu0 %v564_v43  ;;  %v505_v43 = vld [vmem:[#allocation2 + $0x1e8] sm:$0xff] }
  0xb9   :  { %629 = vmatpush.msra.mxu0 %v562_v51  ;;  %v506_v51 = vld [vmem:[#allocation2 + $0x1f0] sm:$0xff] }
  0xbb   :  { %630 = vmatpush.msra.mxu0 %v560_v55  ;;  %v504_v55 = vld [vmem:[#allocation2 + $0x1e0] sm:$0xff] }
  0xbd   :  { %631 = vmatpush.msra.mxu0 %v558_v59  ;;  %v502_v59 = vld [vmem:[#allocation2 + $0x1d0] sm:$0xff] }
 0x10f   :  { %v222_v2 = vpop.f32.mrf.mxu0 }
 0x110   :  { %v274_v6 = vpop.f32.mrf.mxu1 }
 0x111   :  { %v275_v13 = vadd.f32 %v274_v6, %v222_v2  ;;  %v603_v2 = vld [vmem:[#allocation2 + $0x388] sm:$0xff]  ;;  %v601_v6 = vld [vmem:[#allocation2 + $0x378] sm:$0xff] }
 0x115   :  { %v199_v62 = vpop.f32.mrf.mxu2 }
 0x117   :  { %v225_v3 = vpop.f32.mrf.mxu0 }
 0x118   :  { %v277_v11 = vpop.f32.mrf.mxu1 }
 0x119   :  { %v278_v16 = vadd.f32 %v277_v11, %v225_v3  ;;  %v573_v3 = vld [vmem:[#allocation2 + $0x298] sm:$0xff] }
 0x11a   :  { %v569_v11 = vld [vmem:[#allocation2 + $0x278] sm:$0xff] }
 0x11d   :  { %v202_v63 = vpop.f32.mrf.mxu2 }
 0x11f   :  { %v251_v4 = vpop.f32.mrf.mxu0 }
 0x120   :  { %v252_v23 = vadd.f32 %v251_v4, %v199_v62  ;;  %v605_v62 = vld [vmem:[#allocation2 + $0x398] sm:$0xff]  ;;  %v554_v4 = vld [vmem:[#allocation2 + $0x200] sm:$0xff] }
 0x125   :  { %v306_v0 = vpop.f32.mrf.mxu2 }
 0x126   :  { %1569 = vmatmul.msk.f32.vlgmr.msra.gmra.mxu3 %vm175_vm1, %v306_v0  ;;  %1571 = vmatmul.msk.f32.vlgmr.msrb.gmra.mxu0 %vm175_vm1, %v306_v0  ;;  %v556_v0 = vld [vmem:[#allocation2 + $0x210] sm:$0xff] }
 0x127   :  { %v254_v5 = vpop.f32.mrf.mxu0  ;;  %632 = vmatpush.msra.mxu0 %v556_v0  ;;  %v495_v0 = vld [vmem:[#allocation2 + $0x198] sm:$0xff] }
 0x128   :  { %v255_v27 = vadd.f32 %v254_v5, %v202_v63  ;;  %v575_v63 = vld [vmem:[#allocation2 + $0x2a8] sm:$0xff]  ;;  %v606_v5 = vld [vmem:[#allocation2 + $0x3a0] sm:$0xff] }
 0x129   :  { %633 = vmatpush.msra.mxu0 %v554_v4  ;;  %v493_v4 = vld [vmem:[#allocation2 + $0x188] sm:$0xff] }
 0x12b   :  { %698 = vmatpush.msrb.mxu0 %v474_v8  ;;  %v491_v8 = vld [vmem:[#allocation2 + $0x178] sm:$0xff] }
 0x12d   :  { %v309_v1 = vpop.f32.mrf.mxu2  ;;  %699 = vmatpush.msrb.mxu0 %v472_v12  ;;  %v489_v12 = vld [vmem:[#allocation2 + $0x168] sm:$0xff] }
 0x12e   :  { %1570 = vmatmul.msk.f32.gmra.mxu3 %vm175_vm1, %v309_v1  ;;  %1572 = vmatmul.msk.f32.gmra.mxu0 %vm175_vm1, %v309_v1  ;;  %v608_v1 = vld [vmem:[#allocation2 + $0x3b0] sm:$0xff] }
 0x1a3   :  { %v375_v7 = vpop.f32.mrf.mxu0 }
 0x1a4   :  { %v382_v17 = vadd.f32 %v375_v7, %v275_v13  ;;  %v571_v7 = vld [vmem:[#allocation2 + $0x288] sm:$0xff]  ;;  %v602_v13 = vld [vmem:[#allocation2 + $0x380] sm:$0xff] }
 0x1a6   :  { %v392_v24 = vadd.f32 %v388_v18, %v382_v17  ;;  %v600_v17 = vld [vmem:[#allocation2 + $0x370] sm:$0xff] }
 0x1a8   :  { %v1974_v33 = vmax.f32 %v392_v24, 0.0  ;;  %v466_v24 = vld [vmem:[#allocation2 + $0xb0] sm:$0xff] }
 0x1a9   :  { %v352_v15 = vpop.f32.mrf.mxu3 }
 0x1aa   :  { %v381_v28 = vadd.f32 %v352_v15, %v252_v23  ;;  %v567_v15 = vld [vmem:[#allocation2 + $0x268] sm:$0xff] }
 0x1ab   :  { %v378_v20 = vpop.f32.mrf.mxu0  ;;  %v563_v23 = vld [vmem:[#allocation2 + $0x248] sm:$0xff] }
 0x1ac   :  { %v384_v21 = vadd.f32 %v378_v20, %v278_v16  ;;  %v391_v38 = vadd.f32 %v387_v29, %v381_v28  ;;  %v470_v16 = vld [vmem:[#allocation2 + $0xd0] sm:$0xff]  ;;  %v468_v20 = vld [vmem:[#allocation2 + $0xc0] sm:$0xff] }
 0x1ad   :  { %700 = vmatpush.msrb.mxu0 %v470_v16  ;;  %v464_v28 = vld [vmem:[#allocation2 + $0xa0] sm:$0xff]  ;;  %v490_v16 = vld [vmem:[#allocation2 + $0x170] sm:$0xff] }
 0x1ae   :  { %v394_v25 = vadd.f32 %v388_v18, %v384_v21  ;;  %v1984_v44 = vmax.f32 %v391_v38, 0.0  ;;  %v595_v18 = vld [vmem:[#allocation2 + $0x348] sm:$0xff]  ;;  %v598_v21 = vld [vmem:[#allocation2 + $0x360] sm:$0xff]  ;;  %v507_v38 = vld [vmem:[#allocation2 + $0x1f8] sm:$0xff] }
 0x1af   :  { %701 = vmatpush.msrb.mxu0 %v468_v20  ;;  %v486_v20 = vld [vmem:[#allocation2 + $0x150] sm:$0xff] }
 0x1b0   :  { %v1972_v30 = vmax.f32 %v394_v25, 0.0  ;;  %v596_v25 = vld [vmem:[#allocation2 + $0x350] sm:$0xff] }
 0x1b1   :  { %v355_v32 = vpop.f32.mrf.mxu3  ;;  %702 = vmatpush.msrb.mxu0 %v466_v24  ;;  %v451_v24 = vld [vmem:[#allocation2 + $0x38] sm:$0xff] }
 0x1b2   :  { %v383_v34 = vadd.f32 %v355_v32, %v255_v27  ;;  %547 = vmatpush.msrb.mxu3 %v1972_v30  ;;  %v561_v27 = vld [vmem:[#allocation2 + $0x238] sm:$0xff]  ;;  %v559_v32 = vld [vmem:[#allocation2 + $0x228] sm:$0xff] }
 0x1b3   :  { %703 = vmatpush.msrb.mxu0 %v464_v28  ;;  %v483_v28 = vld [vmem:[#allocation2 + $0x138] sm:$0xff] }
 0x1b4   :  { %v393_v39 = vadd.f32 %v387_v29, %v383_v34  ;;  %548 = vmatpush.msrb.mxu3 %v1974_v33  ;;  %v594_v29 = vld [vmem:[#allocation2 + $0x340] sm:$0xff]  ;;  %v462_v34 = vld [vmem:[#allocation2 + $0x90] sm:$0xff] }
 0x1b5   :  { %1577 = vmatmul.msk.f32.vlgmr.msrb.gmra.mxu3 %vm400_vm2, %v1575_v35  ;;  %704 = vmatpush.msrb.mxu0 %v462_v34  ;;  %v478_v34 = vld [vmem:[#allocation2 + $0x110] sm:$0xff] }
 0x1b6   :  { %v1982_v41 = vmax.f32 %v393_v39, 0.0  ;;  %678 = vmatpush.msra.mxu3 %v617_v37  ;;  %v557_v37 = vld [vmem:[#allocation2 + $0x218] sm:$0xff]  ;;  %v590_v39 = vld [vmem:[#allocation2 + $0x320] sm:$0xff] }
 0x1b7   :  { %705 = vmatpush.msrb.mxu0 %v460_v40  ;;  %v854_v40 = vld [vmem:[#allocation2 + $0x4f0] sm:$0xff] }
 0x1b8   :  { %418 = vmatpush.msra.mxu1 %v1982_v41  ;;  %527 = vmatpush.msra.mxu2 %v1982_v41 }
 0x1b9   :  { %679 = vmatpush.msra.mxu3 %v615_v42  ;;  %v555_v42 = vld [vmem:[#allocation2 + $0x208] sm:$0xff] }
 0x1ba   :  { %419 = vmatpush.msra.mxu1 %v1984_v44  ;;  %528 = vmatpush.msra.mxu2 %v1984_v44 }
 0x1bb   :  { %1576 = vmatmul.msk.f32.vlgmr.msra.gmra.mxu2 %vm400_vm2, %v1575_v35  ;;  %1573 = vmatmul.msk.f32.vlgmr.msra.gmra.mxu1 %vm400_vm2, %v399_v45  ;;  %v592_v35 = vld [vmem:[#allocation2 + $0x330] sm:$0xff] }
 0x1bc   :  { %438 = vmatpush.msrb.mxu1 %v1972_v30  ;;  %658 = vmatpush.msrb.mxu2 %v585_v46  ;;  %v475_v46 = vld [vmem:[#allocation2 + $0xf8] sm:$0xff] }
 0x1bd   :  { %680 = vmatpush.msra.mxu3 %v613_v47  ;;  %v503_v47 = vld [vmem:[#allocation2 + $0x1d8] sm:$0xff] }
 0x1be   :  { %439 = vmatpush.msrb.mxu1 %v1974_v33  ;;  %659 = vmatpush.msrb.mxu2 %v583_v49  ;;  %v586_v49 = vld [vmem:[#allocation2 + $0x300] sm:$0xff] }
 0x1bf   :  { %681 = vmatpush.msra.mxu3 %v611_v50  ;;  %v473_v50 = vld [vmem:[#allocation2 + $0xe8] sm:$0xff] }
 0x1c0   :  { %638 = vmatpush.msra.mxu1 %v616_v48  ;;  %660 = vmatpush.msrb.mxu2 %v581_v53  ;;  %v458_v48 = vld [vmem:[#allocation2 + $0x70] sm:$0xff]  ;;  %v471_v53 = vld [vmem:[#allocation2 + $0xd8] sm:$0xff] }
 0x1c1   :  { %682 = vmatpush.msra.mxu3 %v609_v54  ;;  %706 = vmatpush.msrb.mxu0 %v458_v48  ;;  %v456_v54 = vld [vmem:[#allocation2 + $0x60] sm:$0xff]  ;;  %v850_v48 = vld [vmem:[#allocation2 + $0x4d0] sm:$0xff] }
 0x1c2   :  { %639 = vmatpush.msra.mxu1 %v614_v52  ;;  %661 = vmatpush.msrb.mxu2 %v579_v57  ;;  %v501_v52 = vld [vmem:[#allocation2 + $0x1c8] sm:$0xff] }
 0x1c3   :  { %683 = vmatpush.msra.mxu3 %v607_v58  ;;  %1574 = vmatmul.msk.f32.vlgmr.msrb.gmra.mxu1 %vm400_vm2, %v399_v45  ;;  %v588_v45 = vld [vmem:[#allocation2 + $0x310] sm:$0xff]  ;;  %v469_v57 = vld [vmem:[#allocation2 + $0xc8] sm:$0xff] }
 0x1c4   :  { %640 = vmatpush.msra.mxu1 %v612_v56  ;;  %662 = vmatpush.msrb.mxu2 %v577_v60  ;;  %v499_v56 = vld [vmem:[#allocation2 + $0x1b8] sm:$0xff]  ;;  %v454_v58 = vld [vmem:[#allocation2 + $0x50] sm:$0xff]  ;;  %v497_v60 = vld [vmem:[#allocation2 + $0x1a8] sm:$0xff] }
 0x1c5   :  { %684 = vmatpush.msra.mxu3 %v605_v62  ;;  %707 = vmatpush.msrb.mxu0 %v456_v54  ;;  %v452_v62 = vld [vmem:[#allocation2 + $0x40] sm:$0xff] }
 0x1c6   :  { %641 = vmatpush.msra.mxu1 %v610_v61  ;;  %663 = vmatpush.msrb.mxu2 %v575_v63  ;;  %v467_v61 = vld [vmem:[#allocation2 + $0xb8] sm:$0xff]  ;;  %v500_v63 = vld [vmem:[#allocation2 + $0x1c0] sm:$0xff] }
 0x1c7   :  { %685 = vmatpush.msra.mxu3 %v603_v2  ;;  %708 = vmatpush.msrb.mxu0 %v454_v58  ;;  %v450_v2 = vld [vmem:[#allocation2 + $0x30] sm:$0xff]  ;;  %v887_v58 = vld [vmem:[#allocation2 + $0x5f8] sm:$0xff] }
 0x1c8   :  { %642 = vmatpush.msra.mxu1 %v608_v1  ;;  %664 = vmatpush.msrb.mxu2 %v573_v3  ;;  %v465_v1 = vld [vmem:[#allocation2 + $0xa8] sm:$0xff]  ;;  %v498_v3 = vld [vmem:[#allocation2 + $0x1b0] sm:$0xff] }
 0x1c9   :  { %686 = vmatpush.msra.mxu3 %v601_v6  ;;  %709 = vmatpush.msrb.mxu0 %v452_v62  ;;  %v448_v6 = vld [vmem:[#allocation2 + $0x20] sm:$0xff] }
 0x1ca   :  { %643 = vmatpush.msra.mxu1 %v606_v5  ;;  %665 = vmatpush.msrb.mxu2 %v571_v7  ;;  %v463_v5 = vld [vmem:[#allocation2 + $0x98] sm:$0xff]  ;;  %v496_v7 = vld [vmem:[#allocation2 + $0x1a0] sm:$0xff] }
 0x1cb   :  { %687 = vmatpush.msra.mxu3 %v599_v10  ;;  %710 = vmatpush.msrb.mxu0 %v450_v2  ;;  %v446_v10 = vld [vmem:[#allocation2 + $0x10] sm:$0xff]  ;;  %v880_v62 = vld [vmem:[#allocation2 + $0x5c0] sm:$0xff]  ;;  %v879_v2 = vld [vmem:[#allocation2 + $0x5b8] sm:$0xff] }
 0x1cc   :  { %644 = vmatpush.msra.mxu1 %v604_v9  ;;  %666 = vmatpush.msrb.mxu2 %v569_v11  ;;  %v461_v9 = vld [vmem:[#allocation2 + $0x88] sm:$0xff]  ;;  %v494_v11 = vld [vmem:[#allocation2 + $0x190] sm:$0xff] }
 0x1cd   :  { %688 = vmatpush.msra.mxu3 %v597_v14  ;;  %711 = vmatpush.msrb.mxu0 %v448_v6  ;;  %v492_v14 = vld [vmem:[#allocation2 + $0x180] sm:$0xff] }
 0x1ce   :  { %645 = vmatpush.msra.mxu1 %v602_v13  ;;  %667 = vmatpush.msrb.mxu2 %v567_v15  ;;  %v459_v13 = vld [vmem:[#allocation2 + $0x78] sm:$0xff]  ;;  %v457_v15 = vld [vmem:[#allocation2 + $0x68] sm:$0xff]  ;;  %v840_v6 = vld [vmem:[#allocation2 + $0x480] sm:$0xff] }
 0x1cf   :  { %689 = vmatpush.msra.mxu3 %v595_v18  ;;  %712 = vmatpush.msrb.mxu0 %v446_v10  ;;  %v488_v18 = vld [vmem:[#allocation2 + $0x160] sm:$0xff]  ;;  %v874_v10 = vld [vmem:[#allocation2 + $0x590] sm:$0xff] }
 0x1d0   :  { %646 = vmatpush.msra.mxu1 %v600_v17  ;;  %668 = vmatpush.msrb.mxu2 %v565_v19  ;;  %v455_v17 = vld [vmem:[#allocation2 + $0x58] sm:$0xff]  ;;  %v444_v19 = vld [vmem:[#allocation2] sm:$0xff] }
 0x1d1   :  { %690 = vmatpush.msra.mxu3 %v593_v22  ;;  %713 = vmatpush.msrb.mxu0 %v444_v19  ;;  %v487_v22 = vld [vmem:[#allocation2 + $0x158] sm:$0xff] }
 0x1d2   :  { %647 = vmatpush.msra.mxu1 %v598_v21  ;;  %669 = vmatpush.msrb.mxu2 %v563_v23  ;;  %v453_v21 = vld [vmem:[#allocation2 + $0x48] sm:$0xff]  ;;  %v484_v23 = vld [vmem:[#allocation2 + $0x140] sm:$0xff]  ;;  %v871_v19 = vld [vmem:[#allocation2 + $0x578] sm:$0xff] }
 0x1d3   :  { %691 = vmatpush.msra.mxu3 %v591_v26  ;;  %v482_v26 = vld [vmem:[#allocation2 + $0x130] sm:$0xff] }
 0x1d4   :  { %648 = vmatpush.msra.mxu1 %v596_v25  ;;  %670 = vmatpush.msrb.mxu2 %v561_v27  ;;  %v485_v25 = vld [vmem:[#allocation2 + $0x148] sm:$0xff] }
 0x1d5   :  { %692 = vmatpush.msra.mxu3 %v589_v31  ;;  %v449_v27 = vld [vmem:[#allocation2 + $0x28] sm:$0xff]  ;;  %v447_v31 = vld [vmem:[#allocation2 + $0x18] sm:$0xff] }
 0x1d6   :  { %649 = vmatpush.msra.mxu1 %v594_v29  ;;  %671 = vmatpush.msrb.mxu2 %v559_v32  ;;  %v480_v29 = vld [vmem:[#allocation2 + $0x120] sm:$0xff]  ;;  %v481_v32 = vld [vmem:[#allocation2 + $0x128] sm:$0xff] }
 0x1d7   :  { %693 = vmatpush.msra.mxu3 %v587_v36  ;;  %v479_v36 = vld [vmem:[#allocation2 + $0x118] sm:$0xff] }
 0x1d8   :  { %650 = vmatpush.msra.mxu1 %v592_v35  ;;  %672 = vmatpush.msrb.mxu2 %v557_v37  ;;  %v445_v35 = vld [vmem:[#allocation2 + $0x8] sm:$0xff]  ;;  %v476_v37 = vld [vmem:[#allocation2 + $0x100] sm:$0xff] }
 0x1d9   :  { %758 = vmatpush.msrb.mxu3 %v507_v38  ;;  %v477_v38 = vld [vmem:[#allocation2 + $0x108] sm:$0xff] }
 0x1da   :  { %651 = vmatpush.msra.mxu1 %v590_v39  ;;  %673 = vmatpush.msrb.mxu2 %v555_v42  ;;  %v855_v39 = vld [vmem:[#allocation2 + $0x4f8] sm:$0xff] }
 0x1db   :  { %759 = vmatpush.msrb.mxu3 %v505_v43 }
 0x1dc   :  { %652 = vmatpush.msra.mxu1 %v588_v45  ;;  %738 = vmatpush.msra.mxu2 %v475_v46  ;;  %v853_v45 = vld [vmem:[#allocation2 + $0x4e8] sm:$0xff]  ;;  %v852_v46 = vld [vmem:[#allocation2 + $0x4e0] sm:$0xff] }
 0x1dd   :  { %760 = vmatpush.msrb.mxu3 %v503_v47  ;;  %v851_v47 = vld [vmem:[#allocation2 + $0x4d8] sm:$0xff] }
 0x1de   :  { %653 = vmatpush.msra.mxu1 %v586_v49  ;;  %739 = vmatpush.msra.mxu2 %v473_v50  ;;  %v886_v49 = vld [vmem:[#allocation2 + $0x5f0] sm:$0xff] }
 0x1df   :  { %761 = vmatpush.msrb.mxu3 %v501_v52  ;;  %v848_v52 = vld [vmem:[#allocation2 + $0x4c0] sm:$0xff] }
 0x1e0   :  { %718 = vmatpush.msrb.mxu1 %v506_v51  ;;  %740 = vmatpush.msra.mxu2 %v471_v53  ;;  %v849_v51 = vld [vmem:[#allocation2 + $0x4c8] sm:$0xff]  ;;  %v884_v53 = vld [vmem:[#allocation2 + $0x5e0] sm:$0xff] }
 0x1e1   :  { %762 = vmatpush.msrb.mxu3 %v499_v56  ;;  %v882_v56 = vld [vmem:[#allocation2 + $0x5d0] sm:$0xff] }
 0x1e2   :  { %719 = vmatpush.msrb.mxu1 %v504_v55  ;;  %741 = vmatpush.msra.mxu2 %v469_v57  ;;  %v847_v55 = vld [vmem:[#allocation2 + $0x4b8] sm:$0xff]  ;;  %v845_v57 = vld [vmem:[#allocation2 + $0x4a8] sm:$0xff] }
 0x1e3   :  { %763 = vmatpush.msrb.mxu3 %v497_v60  ;;  %v846_v60 = vld [vmem:[#allocation2 + $0x4b0] sm:$0xff] }
 0x1e4   :  { %720 = vmatpush.msrb.mxu1 %v502_v59  ;;  %742 = vmatpush.msra.mxu2 %v467_v61  ;;  %v883_v59 = vld [vmem:[#allocation2 + $0x5d8] sm:$0xff]  ;;  %v844_v61 = vld [vmem:[#allocation2 + $0x4a0] sm:$0xff] }
 0x1e5   :  { %764 = vmatpush.msrb.mxu3 %v495_v0  ;;  %v841_v0 = vld [vmem:[#allocation2 + $0x488] sm:$0xff] }
 0x1e6   :  { %721 = vmatpush.msrb.mxu1 %v500_v63  ;;  %743 = vmatpush.msra.mxu2 %v465_v1  ;;  %v881_v63 = vld [vmem:[#allocation2 + $0x5c8] sm:$0xff]  ;;  %v878_v1 = vld [vmem:[#allocation2 + $0x5b0] sm:$0xff] }
 0x1e7   :  { %765 = vmatpush.msrb.mxu3 %v493_v4  ;;  %v839_v4 = vld [vmem:[#allocation2 + $0x478] sm:$0xff] }
 0x1e8   :  { %722 = vmatpush.msrb.mxu1 %v498_v3  ;;  %744 = vmatpush.msra.mxu2 %v463_v5  ;;  %v876_v3 = vld [vmem:[#allocation2 + $0x5a0] sm:$0xff]  ;;  %v877_v5 = vld [vmem:[#allocation2 + $0x5a8] sm:$0xff] }
 0x1e9   :  { %766 = vmatpush.msrb.mxu3 %v491_v8  ;;  %v837_v8 = vld [vmem:[#allocation2 + $0x468] sm:$0xff] }
 0x1ea   :  { %723 = vmatpush.msrb.mxu1 %v496_v7  ;;  %745 = vmatpush.msra.mxu2 %v461_v9  ;;  %v838_v7 = vld [vmem:[#allocation2 + $0x470] sm:$0xff]  ;;  %v836_v9 = vld [vmem:[#allocation2 + $0x460] sm:$0xff] }
 0x1eb   :  { %767 = vmatpush.msrb.mxu3 %v489_v12  ;;  %v835_v12 = vld [vmem:[#allocation2 + $0x458] sm:$0xff] }
 0x1ec   :  { %724 = vmatpush.msrb.mxu1 %v494_v11  ;;  %746 = vmatpush.msra.mxu2 %v459_v13  ;;  %v875_v11 = vld [vmem:[#allocation2 + $0x598] sm:$0xff]  ;;  %v834_v13 = vld [vmem:[#allocation2 + $0x450] sm:$0xff] }
 0x1ed   :  { %768 = vmatpush.msrb.mxu3 %v487_v22  ;;  %v869_v22 = vld [vmem:[#allocation2 + $0x568] sm:$0xff] }
 0x1ee   :  { %725 = vmatpush.msrb.mxu1 %v492_v14  ;;  %747 = vmatpush.msra.mxu2 %v457_v15  ;;  %v872_v14 = vld [vmem:[#allocation2 + $0x580] sm:$0xff]  ;;  %v873_v15 = vld [vmem:[#allocation2 + $0x588] sm:$0xff] }
 0x1ef   :  { %769 = vmatpush.msrb.mxu3 %v485_v25  ;;  %v828_v25 = vld [vmem:[#allocation2 + $0x420] sm:$0xff] }
 0x1f0   :  { %726 = vmatpush.msrb.mxu1 %v490_v16  ;;  %748 = vmatpush.msra.mxu2 %v455_v17  ;;  %v833_v16 = vld [vmem:[#allocation2 + $0x448] sm:$0xff]  ;;  %v832_v17 = vld [vmem:[#allocation2 + $0x440] sm:$0xff] }
 0x1f1   :  { %770 = vmatpush.msrb.mxu3 %v483_v28  ;;  %v827_v28 = vld [vmem:[#allocation2 + $0x418] sm:$0xff] }
 0x1f2   :  { %727 = vmatpush.msrb.mxu1 %v488_v18  ;;  %749 = vmatpush.msra.mxu2 %v453_v21  ;;  %v870_v18 = vld [vmem:[#allocation2 + $0x570] sm:$0xff]  ;;  %v868_v21 = vld [vmem:[#allocation2 + $0x560] sm:$0xff] }
 0x1f3   :  { %771 = vmatpush.msrb.mxu3 %v481_v32  ;;  %v865_v32 = vld [vmem:[#allocation2 + $0x548] sm:$0xff] }
 0x1f4   :  { %728 = vmatpush.msrb.mxu1 %v486_v20  ;;  %750 = vmatpush.msra.mxu2 %v451_v24  ;;  %v831_v20 = vld [vmem:[#allocation2 + $0x438] sm:$0xff]  ;;  %v829_v24 = vld [vmem:[#allocation2 + $0x428] sm:$0xff] }
 0x1f5   :  { %772 = vmatpush.msrb.mxu3 %v479_v36  ;;  %v863_v36 = vld [vmem:[#allocation2 + $0x538] sm:$0xff] }
 0x1f6   :  { %729 = vmatpush.msrb.mxu1 %v484_v23  ;;  %751 = vmatpush.msra.mxu2 %v449_v27  ;;  %v830_v23 = vld [vmem:[#allocation2 + $0x430] sm:$0xff]  ;;  %v867_v27 = vld [vmem:[#allocation2 + $0x558] sm:$0xff] }
 0x1f7   :  { %773 = vmatpush.msrb.mxu3 %v477_v38  ;;  %v861_v38 = vld [vmem:[#allocation2 + $0x528] sm:$0xff] }
 0x1f8   :  { %730 = vmatpush.msrb.mxu1 %v482_v26  ;;  %752 = vmatpush.msra.mxu2 %v447_v31  ;;  %v866_v26 = vld [vmem:[#allocation2 + $0x550] sm:$0xff]  ;;  %v864_v31 = vld [vmem:[#allocation2 + $0x540] sm:$0xff] }
 0x1fa   :  { %731 = vmatpush.msrb.mxu1 %v480_v29  ;;  %753 = vmatpush.msra.mxu2 %v445_v35  ;;  %v826_v29 = vld [vmem:[#allocation2 + $0x410] sm:$0xff] }
 0x1fb   :  { %v862_v35 = vld [vmem:[#allocation2 + $0x530] sm:$0xff] }
 0x1fc   :  { %732 = vmatpush.msrb.mxu1 %v478_v34  ;;  %v825_v34 = vld [vmem:[#allocation2 + $0x408] sm:$0xff] }
 0x1fe   :  { %733 = vmatpush.msrb.mxu1 %v476_v37  ;;  %v860_v37 = vld [vmem:[#allocation2 + $0x520] sm:$0xff] }
 0x238   :  { %v550_v42 = vpop.f32.mrf.mxu3  ;;  %v421_v43 = vpop.f32.mrf.mxu1 }
 0x239   :  { %654 = vmatmul.f32.vlgmr.msra.gmra.mxu1 %v550_v42  ;;  %694 = vmatmul.f32.vlgmr.msra.gmra.mxu3 %v550_v42  ;;  %v859_v42 = vld [vmem:[#allocation2 + $0x518] sm:$0xff] }
 0x23a   :  { %928 = vmatpush.msra.mxu3 %v855_v39  ;;  %888 = vmatpush.msra.mxu1 %v854_v40  ;;  %v824_v39 = vld [vmem:[#allocation2 + $0x400] sm:$0xff]  ;;  %v858_v40 = vld [vmem:[#allocation2 + $0x510] sm:$0xff] }
 0x23c   :  { %929 = vmatpush.msra.mxu3 %v853_v45  ;;  %889 = vmatpush.msra.mxu1 %v852_v46  ;;  %v857_v45 = vld [vmem:[#allocation2 + $0x508] sm:$0xff] }
 0x23e   :  { %v530_v50 = vpop.f32.mrf.mxu2  ;;  %930 = vmatpush.msra.mxu3 %v851_v47  ;;  %890 = vmatpush.msra.mxu1 %v850_v48 }
 0x23f   :  { %634 = vmatmul.f32.vlgmr.msra.gmra.mxu0 %v530_v50  ;;  %674 = vmatmul.f32.vlgmr.msrb.gmra.mxu2 %v530_v50 }
 0x240   :  { %797 = vmatpush.msra.mxu0 %v1982_v41  ;;  %908 = vmatpush.msrb.mxu2 %v886_v49  ;;  %v441_v54 = vpop.f32.mrf.mxu1  ;;  %v1578_v41 = vld [vmem:[%s2103_s4 + $0x10] sm:$0xff] }
 0x241   :  { %931 = vmatpush.msra.mxu3 %v849_v51  ;;  %891 = vmatpush.msra.mxu1 %v848_v52 }
 0x242   :  { %798 = vmatpush.msra.mxu0 %v1984_v44  ;;  %734 = vmatmul.f32.vlgmr.msrb.gmra.mxu1 %v441_v54  ;;  %v885_v44 = vld [vmem:[#allocation2 + $0x5e8] sm:$0xff] }
 0x243   :  { %774 = vmatmul.f32.vlgmr.msrb.gmra.mxu3 %v441_v54  ;;  %909 = vmatpush.msrb.mxu2 %v884_v53 }
 0x244   :  { %932 = vmatpush.msra.mxu3 %v847_v55  ;;  %892 = vmatpush.msra.mxu1 %v846_v60 }
 0x245   :  { %910 = vmatpush.msrb.mxu2 %v882_v56 }
 0x246   :  { %933 = vmatpush.msra.mxu3 %v845_v57  ;;  %893 = vmatpush.msra.mxu1 %v844_v61 }
 0x247   :  { %714 = vmatmul.f32.vlgmr.msrb.gmra.mxu0 %v421_v43  ;;  %754 = vmatmul.f32.vlgmr.msra.gmra.mxu2 %v421_v43  ;;  %v856_v43 = vld [vmem:[#allocation2 + $0x500] sm:$0xff] }
 0x248   :  { %817 = vmatpush.msrb.mxu0 %v1972_v30  ;;  %v843_v30 = vld [vmem:[#allocation2 + $0x498] sm:$0xff]  ;;  %911 = vmatpush.msrb.mxu2 %v880_v62 }
 0x249   :  { %934 = vmatpush.msra.mxu3 %v843_v30 }
 0x24a   :  { %818 = vmatpush.msrb.mxu0 %v1974_v33  ;;  %v842_v33 = vld [vmem:[#allocation2 + $0x490] sm:$0xff]  ;;  %912 = vmatpush.msrb.mxu2 %v878_v1 }
 0x24b   :  { %894 = vmatpush.msra.mxu1 %v842_v33  ;;  %935 = vmatpush.msra.mxu3 %v841_v0 }
 0x24c   :  { %913 = vmatpush.msrb.mxu2 %v876_v3 }
 0x24d   :  { %936 = vmatpush.msra.mxu3 %v839_v4  ;;  %895 = vmatpush.msra.mxu1 %v840_v6  ;;  %v1583_v6 = vld [vmem:[%s2106_s7 + $0x2] sm:$0x3] }
 0x24e   :  { %914 = vmatpush.msrb.mxu2 %v874_v10  ;;  %v980_v10 = vld [vmem:[%s2106_s7] sm:$0x3] }
 0x24f   :  { %1579 = vmatmul.msk.f32.vlgmr.msra.gmra.mxu0 %vm400_vm2, %v1578_v41  ;;  %937 = vmatpush.msra.mxu3 %v837_v8 }
 0x250   :  { %948 = vmatpush.msra.mxu0 %v887_v58  ;;  %896 = vmatpush.msra.mxu1 %v838_v7  ;;  %v1134_v7 = vld [vmem:[#allocation5 + $0x1f8] sm:$0xff] }
 0x251   :  { %938 = vmatpush.msra.mxu3 %v835_v12  ;;  %915 = vmatpush.msrb.mxu2 %v872_v14  ;;  %v1132_v12 = vld [vmem:[#allocation5 + $0x1e8] sm:$0xff]  ;;  %v1118_v14 = vld [vmem:[#allocation5 + $0x178] sm:$0xff] }
 0x252   :  { %949 = vmatpush.msra.mxu0 %v885_v44  ;;  %897 = vmatpush.msra.mxu1 %v836_v9  ;;  %v970_v44 = vld [vmem:[%s2105_s6] sm:$0x3]  ;;  %v1133_v9 = vld [vmem:[#allocation5 + $0x1f0] sm:$0xff] }
 0x253   :  { %939 = vmatpush.msra.mxu3 %v833_v16  ;;  %916 = vmatpush.msrb.mxu2 %v870_v18  ;;  %v973_v33 = vperm.slane %v970_v44, 1  ;;  %v1117_v16 = vld [vmem:[#allocation5 + $0x170] sm:$0xff]  ;;  %v1130_v18 = vld [vmem:[#allocation5 + $0x1d8] sm:$0xff] }
 0x254   :  { %950 = vmatpush.msra.mxu0 %v883_v59  ;;  %898 = vmatpush.msra.mxu1 %v834_v13 }
 0x255   :  { %940 = vmatpush.msra.mxu3 %v831_v20  ;;  %917 = vmatpush.msrb.mxu2 %v868_v21  ;;  %v1116_v20 = vld [vmem:[#allocation5 + $0x168] sm:$0xff]  ;;  %v1039_v21 = vld [vmem:[#allocation5 + $0x70] sm:$0xff] }
 0x256   :  { %951 = vmatpush.msra.mxu0 %v881_v63  ;;  %899 = vmatpush.msra.mxu1 %v832_v17  ;;  %v1040_v17 = vld [vmem:[#allocation5 + $0x78] sm:$0xff] }
 0x257   :  { %1580 = vmatmul.msk.f32.vlgmr.msrb.gmra.mxu0 %vm400_vm2, %v1578_v41  ;;  %941 = vmatpush.msra.mxu3 %v829_v24  ;;  %v1115_v24 = vld [vmem:[#allocation5 + $0x160] sm:$0xff] }
 0x258   :  { %952 = vmatpush.msra.mxu0 %v879_v2  ;;  %900 = vmatpush.msra.mxu1 %v830_v23  ;;  %v1055_v23 = vld [vmem:[#allocation5 + $0xf0] sm:$0xff] }
 0x259   :  { %918 = vmatpush.msrb.mxu2 %v866_v26  ;;  %942 = vmatpush.msra.mxu3 %v827_v28  ;;  %v1128_v26 = vld [vmem:[#allocation5 + $0x1c8] sm:$0xff]  ;;  %v1114_v28 = vld [vmem:[#allocation5 + $0x158] sm:$0xff] }
 0x25a   :  { %953 = vmatpush.msra.mxu0 %v877_v5  ;;  %901 = vmatpush.msra.mxu1 %v828_v25  ;;  %v972_v5 = vperm.slane %v970_v44, 0  ;;  %v1038_v25 = vld [vmem:[#allocation5 + $0x68] sm:$0xff]  ;;  %v1052_v44 = vld [vmem:[#allocation5 + $0xd8] sm:$0xff] }
 0x25b   :  { %919 = vmatpush.msrb.mxu2 %v864_v31  ;;  %943 = vmatpush.msra.mxu3 %v825_v34  ;;  %v1127_v31 = vld [vmem:[#allocation5 + $0x1c0] sm:$0xff]  ;;  %v1113_v34 = vld [vmem:[#allocation5 + $0x150] sm:$0xff] }
 0x25c   :  { %954 = vmatpush.msra.mxu0 %v875_v11  ;;  %902 = vmatpush.msra.mxu1 %v826_v29  ;;  %v1037_v29 = vld [vmem:[#allocation5 + $0x60] sm:$0xff] }
 0x25d   :  { %920 = vmatpush.msrb.mxu2 %v862_v35  ;;  %v1036_v35 = vld [vmem:[#allocation5 + $0x58] sm:$0xff] }
 0x25e   :  { %955 = vmatpush.msra.mxu0 %v873_v15  ;;  %903 = vmatpush.msra.mxu1 %v824_v39  ;;  %v1131_v15 = vld [vmem:[#allocation5 + $0x1e0] sm:$0xff]  ;;  %v1125_v39 = vld [vmem:[#allocation5 + $0x1b0] sm:$0xff] }
 0x25f   :  { %921 = vmatpush.msrb.mxu2 %v860_v37  ;;  %v1112_v37 = vld [vmem:[#allocation5 + $0x148] sm:$0xff] }
 0x260   :  { %956 = vmatpush.msra.mxu0 %v871_v19  ;;  %v1056_v19 = vld [vmem:[#allocation5 + $0xf8] sm:$0xff] }
 0x261   :  { %922 = vmatpush.msrb.mxu2 %v858_v40  ;;  %v1111_v40 = vld [vmem:[#allocation5 + $0x140] sm:$0xff] }
 0x262   :  { %957 = vmatpush.msra.mxu0 %v869_v22  ;;  %v1129_v22 = vld [vmem:[#allocation5 + $0x1d0] sm:$0xff] }
 0x263   :  { %923 = vmatpush.msrb.mxu2 %v856_v43  ;;  %v1124_v43 = vld [vmem:[#allocation5 + $0x1a8] sm:$0xff] }
 0x264   :  { %958 = vmatpush.msra.mxu0 %v867_v27  ;;  %v1054_v27 = vld [vmem:[#allocation5 + $0xe8] sm:$0xff] }
 0x266   :  { %959 = vmatpush.msra.mxu0 %v865_v32  ;;  %v1053_v32 = vld [vmem:[#allocation5 + $0xe0] sm:$0xff] }
 0x268   :  { %960 = vmatpush.msra.mxu0 %v863_v36  ;;  %v1126_v36 = vld [vmem:[#allocation5 + $0x1b8] sm:$0xff] }
 0x26a   :  { %961 = vmatpush.msra.mxu0 %v861_v38  ;;  %v1035_v38 = vld [vmem:[#allocation5 + $0x50] sm:$0xff] }
 0x26c   :  { %962 = vmatpush.msra.mxu0 %v859_v42  ;;  %v1034_v42 = vld [vmem:[#allocation5 + $0x48] sm:$0xff] }
 0x26e   :  { %963 = vmatpush.msra.mxu0 %v857_v45  ;;  %v1110_v45 = vld [vmem:[#allocation5 + $0x138] sm:$0xff] }
 0x2b6   :  { %v655_v47 = vpop.f32.mrf.mxu1 }
 0x2bc   :  { %v635_v46 = vpop.f32.mrf.mxu0  ;;  %v695_v54 = vpop.f32.mrf.mxu3 }
 0x2bd   :  { %v656_v48 = vadd.f32 %v655_v47, %v635_v46  ;;  %v1033_v46 = vld [vmem:[#allocation5 + $0x40] sm:$0xff] }
 0x2be   :  { %v1123_v47 = vld [vmem:[#allocation5 + $0x1a0] sm:$0xff] }
 0x2bf   :  { %v735_v58 = vpop.f32.mrf.mxu1 }
 0x2c2   :  { %v675_v53 = vpop.f32.mrf.mxu2 }
 0x2c3   :  { %v696_v57 = vadd.f32 %v695_v54, %v675_v53  ;;  %v1120_v53 = vld [vmem:[#allocation5 + $0x188] sm:$0xff]  ;;  %v1106_v54 = vld [vmem:[#allocation5 + $0x118] sm:$0xff] }
 0x2c4   :  { %v715_v49 = vpop.f32.mrf.mxu0 }
 0x2c5   :  { %v716_v50 = vadd.f32 %v715_v49, %v656_v48  ;;  %v1109_v48 = vld [vmem:[#allocation5 + $0x130] sm:$0xff]  ;;  %v1122_v49 = vld [vmem:[#allocation5 + $0x198] sm:$0xff] }
 0x2c6   :  { %v775_v55 = vpop.f32.mrf.mxu3 }
 0x2c7   :  { %v736_v0 = vadd.f32 %v735_v58, %v716_v50  ;;  %v1108_v50 = vld [vmem:[#allocation5 + $0x128] sm:$0xff]  ;;  %v1032_v58 = vld [vmem:[#allocation5 + $0x38] sm:$0xff] }
 0x2ca   :  { %v755_v56 = vpop.f32.mrf.mxu2 }
 0x2cb   :  { %v756_v41 = vadd.f32 %v755_v56, %v696_v57  ;;  %v1105_v56 = vld [vmem:[#allocation5 + $0x110] sm:$0xff]  ;;  %v1104_v57 = vld [vmem:[#allocation5 + $0x108] sm:$0xff] }
 0x2cc   :  { %v800_v51 = vpop.f32.mrf.mxu0 }
 0x2cd   :  { %944 = vmatmul.f32.vlgmr.msra.gmra.mxu3 %v800_v51  ;;  %904 = vmatmul.f32.vlgmr.msra.gmra.mxu1 %v800_v51  ;;  %v776_v61 = vadd.f32 %v775_v55, %v756_v41  ;;  %v1121_v51 = vld [vmem:[#allocation5 + $0x190] sm:$0xff]  ;;  %v1119_v55 = vld [vmem:[#allocation5 + $0x180] sm:$0xff] }
 0x2ce   :  { %v1103_v41 = vld [vmem:[#allocation5 + $0x100] sm:$0xff] }
 0x2d4   :  { %v820_v52 = vpop.f32.mrf.mxu0 }
 0x2d5   :  { %924 = vmatmul.f32.vlgmr.msrb.gmra.mxu2 %v820_v52  ;;  %964 = vmatmul.f32.vlgmr.msra.gmra.mxu0 %v820_v52  ;;  %v1107_v52 = vld [vmem:[#allocation5 + $0x120] sm:$0xff] }
 0x34a   :  { %v905_v1 = vpop.f32.mrf.mxu1 }
 0x350   :  { %v945_v59 = vpop.f32.mrf.mxu3 }
 0x352   :  { %v965_v60 = vpop.f32.mrf.mxu0 }
 0x353   :  { %v966_v30 = vadd.f32 %v965_v60, %v945_v59  ;;  %v1031_v59 = vld [vmem:[#allocation5 + $0x30] sm:$0xff] }
 0x354   :  { %v1051_v60 = vld [vmem:[#allocation5 + $0xd0] sm:$0xff] }
 0x355   :  { %v969_v62 = vadd.f32 %v966_v30, %v776_v61  ;;  %v1030_v61 = vld [vmem:[#allocation5 + $0x28] sm:$0xff] }
 0x356   :  { %v1050_v30 = vld [vmem:[#allocation5 + $0xc8] sm:$0xff] }
 0x357   :  { %v977_v63 = vadd.f32 %v973_v33, %v969_v62  ;;  %v1029_v33 = vld [vmem:[#allocation5 + $0x20] sm:$0xff] }
 0x358   :  { %v925_v2 = vpop.f32.mrf.mxu2  ;;  %v1049_v62 = vld [vmem:[#allocation5 + $0xc0] sm:$0xff] }
 0x359   :  { %v2010_v3 = vmax.f32 %v977_v63, 0.0  ;;  %v926_v4 = vadd.f32 %v925_v2, %v905_v1  ;;  %v1028_v63 = vld [vmem:[#allocation5 + $0x18] sm:$0xff]  ;;  %v1027_v1 = vld [vmem:[#allocation5 + $0x10] sm:$0xff] }
 0x35a   :  { %v1047_v2 = vld [vmem:[#allocation5 + $0xb0] sm:$0xff] }
 0x35b   :  { %v968_v8 = vadd.f32 %v926_v4, %v736_v0  ;;  %1020 = vmatpush.msra.mxu2 %v2010_v3  ;;  %1097 = vmatpush.msrb.mxu0 %v2010_v3  ;;  %v1048_v0 = vld [vmem:[#allocation5 + $0xb8] sm:$0xff]  ;;  %v1026_v4 = vld [vmem:[#allocation5 + $0x8] sm:$0xff] }
 0x35c   :  { %1585 = vmatmul.msk.f32.vlgmr.msrb.gmra.mxu0 %vm981_vm3, %v1583_v6  ;;  %1582 = vmatmul.msk.f32.vlgmr.msra.gmra.mxu2 %vm981_vm3, %v980_v10 }
 0x35d   :  { %1155 = vmatpush.msrb.mxu2 %v1134_v7  ;;  %v976_v11 = vadd.f32 %v972_v5, %v968_v8  ;;  %1195 = vmatpush.msra.mxu0 %v1056_v19  ;;  %v1046_v5 = vld [vmem:[#allocation5 + $0xa8] sm:$0xff]  ;;  %v1045_v7 = vld [vmem:[#allocation5 + $0xa0] sm:$0xff]  ;;  %v1044_v8 = vld [vmem:[#allocation5 + $0x98] sm:$0xff] }
 0x35e   :  { %v1273_v19 = vld [vmem:[#allocation5 + $0x260] sm:$0xff] }
 0x35f   :  { %1156 = vmatpush.msrb.mxu2 %v1133_v9  ;;  %v2022_v13 = vmax.f32 %v976_v11, 0.0  ;;  %1196 = vmatpush.msra.mxu0 %v1055_v23  ;;  %v1043_v9 = vld [vmem:[#allocation5 + $0x90] sm:$0xff]  ;;  %v1041_v11 = vld [vmem:[#allocation5 + $0x80] sm:$0xff] }
 0x360   :  { %v1586_v23 = vld [vmem:[%s2106_s7 + $0x4] sm:$0x3] }
 0x361   :  { %1157 = vmatpush.msrb.mxu2 %v1132_v12  ;;  %1000 = vmatpush.msrb.mxu1 %v2022_v13  ;;  %v1276_v12 = vld [vmem:[#allocation5 + $0x278] sm:$0xff] }
 0x362   :  { %1077 = vmatpush.msrb.mxu3 %v2022_v13  ;;  %1581 = vmatmul.msk.f32.vlgmr.msrb.gmra.mxu1 %vm981_vm3, %v980_v10  ;;  %v1042_v10 = vld [vmem:[#allocation5 + $0x88] sm:$0xff] }
 0x363   :  { %1584 = vmatmul.msk.f32.vlgmr.msrb.gmra.mxu3 %vm981_vm3, %v1583_v6  ;;  %1135 = vmatpush.msra.mxu1 %v1118_v14  ;;  %v1025_v6 = vld [vmem:[#allocation5] sm:$0xff]  ;;  %v1275_v14 = vld [vmem:[#allocation5 + $0x270] sm:$0xff] }
 0x364   :  { %1158 = vmatpush.msrb.mxu2 %v1131_v15  ;;  %1175 = vmatpush.msra.mxu3 %v1040_v17  ;;  %v1274_v15 = vld [vmem:[#allocation5 + $0x268] sm:$0xff] }
 0x365   :  { %1136 = vmatpush.msra.mxu1 %v1117_v16  ;;  %1197 = vmatpush.msra.mxu0 %v1054_v27  ;;  %v1292_v16 = vld [vmem:[#allocation5 + $0x2f8] sm:$0xff] }
 0x366   :  { %1159 = vmatpush.msrb.mxu2 %v1130_v18  ;;  %1176 = vmatpush.msra.mxu3 %v1039_v21  ;;  %v1291_v18 = vld [vmem:[#allocation5 + $0x2f0] sm:$0xff]  ;;  %v1272_v21 = vld [vmem:[#allocation5 + $0x258] sm:$0xff] }
 0x367   :  { %1137 = vmatpush.msra.mxu1 %v1116_v20  ;;  %1198 = vmatpush.msra.mxu0 %v1053_v32  ;;  %v1290_v20 = vld [vmem:[#allocation5 + $0x2e8] sm:$0xff]  ;;  %v1411_v27 = vld [vmem:[#allocation5 + $0x3f8] sm:$0xff] }
 0x368   :  { %1160 = vmatpush.msrb.mxu2 %v1129_v22  ;;  %1177 = vmatpush.msra.mxu3 %v1038_v25  ;;  %v1289_v22 = vld [vmem:[#allocation5 + $0x2e0] sm:$0xff]  ;;  %v1409_v32 = vld [vmem:[#allocation5 + $0x3e8] sm:$0xff] }
 0x369   :  { %1138 = vmatpush.msra.mxu1 %v1115_v24  ;;  %1199 = vmatpush.msra.mxu0 %v1052_v44  ;;  %v1271_v24 = vld [vmem:[#allocation5 + $0x250] sm:$0xff]  ;;  %v1281_v44 = vld [vmem:[#allocation5 + $0x2a0] sm:$0xff] }
 0x36a   :  { %1161 = vmatpush.msrb.mxu2 %v1128_v26  ;;  %1178 = vmatpush.msra.mxu3 %v1037_v29  ;;  %v1410_v29 = vld [vmem:[#allocation5 + $0x3f0] sm:$0xff] }
 0x36b   :  { %1139 = vmatpush.msra.mxu1 %v1114_v28  ;;  %1200 = vmatpush.msra.mxu0 %v1051_v60  ;;  %v1288_v28 = vld [vmem:[#allocation5 + $0x2d8] sm:$0xff]  ;;  %v1279_v60 = vld [vmem:[#allocation5 + $0x290] sm:$0xff] }
 0x36c   :  { %1162 = vmatpush.msrb.mxu2 %v1127_v31  ;;  %1179 = vmatpush.msra.mxu3 %v1036_v35  ;;  %v1269_v31 = vld [vmem:[#allocation5 + $0x240] sm:$0xff] }
 0x36d   :  { %1140 = vmatpush.msra.mxu1 %v1113_v34  ;;  %1201 = vmatpush.msra.mxu0 %v1050_v30  ;;  %v1408_v35 = vld [vmem:[#allocation5 + $0x3e0] sm:$0xff] }
 0x36e   :  { %1163 = vmatpush.msrb.mxu2 %v1126_v36  ;;  %1180 = vmatpush.msra.mxu3 %v1035_v38  ;;  %v1589_v36 = vld [vmem:[%s2106_s7 + $0x6] sm:$0x3]  ;;  %v1406_v38 = vld [vmem:[#allocation5 + $0x3d0] sm:$0xff] }
 0x36f   :  { %1141 = vmatpush.msra.mxu1 %v1112_v37  ;;  %1202 = vmatpush.msra.mxu0 %v1049_v62  ;;  %v1407_v37 = vld [vmem:[#allocation5 + $0x3d8] sm:$0xff]  ;;  %v1388_v30 = vld [vmem:[#allocation5 + $0x340] sm:$0xff]  ;;  %v1278_v62 = vld [vmem:[#allocation5 + $0x288] sm:$0xff] }
 0x370   :  { %1164 = vmatpush.msrb.mxu2 %v1125_v39  ;;  %1181 = vmatpush.msra.mxu3 %v1034_v42  ;;  %v1395_v39 = vld [vmem:[#allocation5 + $0x378] sm:$0xff]  ;;  %v1394_v42 = vld [vmem:[#allocation5 + $0x370] sm:$0xff] }
 0x371   :  { %1142 = vmatpush.msra.mxu1 %v1111_v40  ;;  %1203 = vmatpush.msra.mxu0 %v1048_v0  ;;  %v1405_v40 = vld [vmem:[#allocation5 + $0x3c8] sm:$0xff]  ;;  %v1387_v0 = vld [vmem:[#allocation5 + $0x338] sm:$0xff] }
 0x372   :  { %1165 = vmatpush.msrb.mxu2 %v1124_v43  ;;  %1182 = vmatpush.msra.mxu3 %v1033_v46  ;;  %v1392_v43 = vld [vmem:[#allocation5 + $0x360] sm:$0xff]  ;;  %v1286_v46 = vld [vmem:[#allocation5 + $0x2c8] sm:$0xff] }
 0x373   :  { %1143 = vmatpush.msra.mxu1 %v1110_v45  ;;  %1204 = vmatpush.msra.mxu0 %v1047_v2  ;;  %v1287_v45 = vld [vmem:[#allocation5 + $0x2d0] sm:$0xff] }
 0x374   :  { %1166 = vmatpush.msrb.mxu2 %v1123_v47  ;;  %1183 = vmatpush.msra.mxu3 %v1032_v58  ;;  %v1285_v47 = vld [vmem:[#allocation5 + $0x2c0] sm:$0xff]  ;;  %v1402_v58 = vld [vmem:[#allocation5 + $0x3b0] sm:$0xff] }
 0x375   :  { %1144 = vmatpush.msra.mxu1 %v1109_v48  ;;  %1205 = vmatpush.msra.mxu0 %v1046_v5  ;;  %v1284_v48 = vld [vmem:[#allocation5 + $0x2b8] sm:$0xff]  ;;  %v1263_v2 = vld [vmem:[#allocation5 + $0x210] sm:$0xff] }
 0x376   :  { %1167 = vmatpush.msrb.mxu2 %v1122_v49  ;;  %1184 = vmatpush.msra.mxu3 %v1031_v59  ;;  %v1283_v49 = vld [vmem:[#allocation5 + $0x2b0] sm:$0xff]  ;;  %v1280_v59 = vld [vmem:[#allocation5 + $0x298] sm:$0xff] }
 0x377   :  { %1145 = vmatpush.msra.mxu1 %v1108_v50  ;;  %1206 = vmatpush.msra.mxu0 %v1045_v7  ;;  %v1282_v50 = vld [vmem:[#allocation5 + $0x2a8] sm:$0xff]  ;;  %v1399_v5 = vld [vmem:[#allocation5 + $0x398] sm:$0xff] }
 0x378   :  { %1168 = vmatpush.msrb.mxu2 %v1121_v51  ;;  %1185 = vmatpush.msra.mxu3 %v1030_v61  ;;  %v1268_v51 = vld [vmem:[#allocation5 + $0x238] sm:$0xff]  ;;  %v1265_v61 = vld [vmem:[#allocation5 + $0x220] sm:$0xff]  ;;  %v1385_v7 = vld [vmem:[#allocation5 + $0x328] sm:$0xff] }
 0x379   :  { %1146 = vmatpush.msra.mxu1 %v1107_v52  ;;  %1207 = vmatpush.msra.mxu0 %v1044_v8  ;;  %v1391_v52 = vld [vmem:[#allocation5 + $0x358] sm:$0xff]  ;;  %v1398_v8 = vld [vmem:[#allocation5 + $0x390] sm:$0xff] }
 0x37a   :  { %1169 = vmatpush.msrb.mxu2 %v1120_v53  ;;  %1186 = vmatpush.msra.mxu3 %v1029_v33  ;;  %v1404_v53 = vld [vmem:[#allocation5 + $0x3c0] sm:$0xff]  ;;  %v1401_v33 = vld [vmem:[#allocation5 + $0x3a8] sm:$0xff] }
 0x37b   :  { %1147 = vmatpush.msra.mxu1 %v1106_v54  ;;  %1208 = vmatpush.msra.mxu0 %v1043_v9  ;;  %v1267_v54 = vld [vmem:[#allocation5 + $0x230] sm:$0xff]  ;;  %v1277_v9 = vld [vmem:[#allocation5 + $0x280] sm:$0xff] }
 0x37c   :  { %1170 = vmatpush.msrb.mxu2 %v1119_v55  ;;  %1187 = vmatpush.msra.mxu3 %v1028_v63  ;;  %v1390_v55 = vld [vmem:[#allocation5 + $0x350] sm:$0xff]  ;;  %v1264_v63 = vld [vmem:[#allocation5 + $0x218] sm:$0xff] }
 0x37d   :  { %1148 = vmatpush.msra.mxu1 %v1105_v56  ;;  %1209 = vmatpush.msra.mxu0 %v1042_v10  ;;  %v1403_v56 = vld [vmem:[#allocation5 + $0x3b8] sm:$0xff]  ;;  %v1261_v10 = vld [vmem:[#allocation5 + $0x200] sm:$0xff] }
 0x37e   :  { %1255 = vmatpush.msra.mxu2 %v2010_v3  ;;  %1188 = vmatpush.msra.mxu3 %v1027_v1  ;;  %v1400_v1 = vld [vmem:[#allocation5 + $0x3a0] sm:$0xff] }
 0x37f   :  { %1149 = vmatpush.msra.mxu1 %v1104_v57  ;;  %1210 = vmatpush.msra.mxu0 %v1041_v11  ;;  %v1266_v57 = vld [vmem:[#allocation5 + $0x228] sm:$0xff]  ;;  %v1384_v11 = vld [vmem:[#allocation5 + $0x320] sm:$0xff] }
 0x380   :  { %1189 = vmatpush.msra.mxu3 %v1026_v4  ;;  %v1386_v4 = vld [vmem:[#allocation5 + $0x330] sm:$0xff] }
 0x381   :  { %1150 = vmatpush.msra.mxu1 %v1103_v41  ;;  %1313 = vmatpush.msrb.mxu0 %v1292_v16  ;;  %v1389_v41 = vld [vmem:[#allocation5 + $0x348] sm:$0xff]  ;;  %v1382_v16 = vld [vmem:[#allocation5 + $0x310] sm:$0xff] }
 0x382   :  { %1190 = vmatpush.msra.mxu3 %v1025_v6  ;;  %v1262_v6 = vld [vmem:[#allocation5 + $0x208] sm:$0xff] }
 0x383   :  { %1235 = vmatpush.msrb.mxu1 %v2022_v13  ;;  %1314 = vmatpush.msrb.mxu0 %v1291_v18  ;;  %v1380_v18 = vld [vmem:[#allocation5 + $0x300] sm:$0xff] }
 0x384   :  { %1293 = vmatpush.msrb.mxu3 %v1276_v12  ;;  %v1397_v12 = vld [vmem:[#allocation5 + $0x388] sm:$0xff] }
 0x385   :  { %1315 = vmatpush.msrb.mxu0 %v1290_v20  ;;  %v1473_v20 = vld [vmem:[%s2109_s10 + $0x70] sm:$0xff] }
 0x386   :  { %1294 = vmatpush.msrb.mxu3 %v1275_v14  ;;  %v1383_v14 = vld [vmem:[#allocation5 + $0x318] sm:$0xff] }
 0x387   :  { %1316 = vmatpush.msrb.mxu0 %v1289_v22  ;;  %v1471_v22 = vld [vmem:[%s2109_s10 + $0x60] sm:$0xff] }
 0x388   :  { %1295 = vmatpush.msrb.mxu3 %v1274_v15  ;;  %v1396_v15 = vld [vmem:[#allocation5 + $0x380] sm:$0xff] }
 0x389   :  { %1317 = vmatpush.msrb.mxu0 %v1288_v28  ;;  %v1466_v28 = vld [vmem:[%s2109_s10 + $0x38] sm:$0xff] }
 0x38a   :  { %1296 = vmatpush.msrb.mxu3 %v1273_v19  ;;  %v1474_v19 = vld [vmem:[%s2109_s10 + $0x78] sm:$0xff] }
 0x38b   :  { %1318 = vmatpush.msrb.mxu0 %v1287_v45 }
 0x38c   :  { %1297 = vmatpush.msrb.mxu3 %v1272_v21  ;;  %v1472_v21 = vld [vmem:[%s2109_s10 + $0x68] sm:$0xff] }
 0x38d   :  { %1319 = vmatpush.msrb.mxu0 %v1286_v46 }
 0x38e   :  { %1298 = vmatpush.msrb.mxu3 %v1271_v24  ;;  %v1469_v24 = vld [vmem:[%s2109_s10 + $0x50] sm:$0xff] }
 0x38f   :  { %1320 = vmatpush.msrb.mxu0 %v1285_v47 }
 0x391   :  { %1321 = vmatpush.msrb.mxu0 %v1284_v48 }
 0x393   :  { %1322 = vmatpush.msrb.mxu0 %v1283_v49 }
 0x395   :  { %1323 = vmatpush.msrb.mxu0 %v1282_v50 }
 0x397   :  { %1324 = vmatpush.msrb.mxu0 %v1281_v44 }
 0x399   :  { %1325 = vmatpush.msrb.mxu0 %v1280_v59 }
 0x39b   :  { %1326 = vmatpush.msrb.mxu0 %v1279_v60 }
 0x39d   :  { %1327 = vmatpush.msrb.mxu0 %v1278_v62 }
 0x39f   :  { %1328 = vmatpush.msrb.mxu0 %v1277_v9 }
 0x3d9   :  { %v1099_v17 = vpop.f32.mrf.mxu0 }
 0x3da   :  { %1171 = vmatmul.f32.vlgmr.msrb.gmra.mxu2 %v1099_v17  ;;  %v1381_v17 = vld [vmem:[#allocation5 + $0x308] sm:$0xff] }
 0x3db   :  { %1374 = vmatpush.msrb.mxu2 %v2010_v3  ;;  %v1270_v3 = vld [vmem:[#allocation5 + $0x248] sm:$0xff] }
 0x3dc   :  { %1299 = vmatpush.msrb.mxu3 %v1270_v3 }
 0x3de   :  { %1300 = vmatpush.msrb.mxu3 %v1269_v31  ;;  %v1465_v31 = vld [vmem:[%s2109_s10 + $0x30] sm:$0xff] }
 0x3df   :  { %v1002_v25 = vpop.f32.mrf.mxu1  ;;  %v1022_v26 = vpop.f32.mrf.mxu2 }
 0x3e0   :  { %1191 = vmatmul.f32.vlgmr.msra.gmra.mxu3 %v1002_v25  ;;  %1211 = vmatmul.f32.vlgmr.msra.gmra.mxu0 %v1022_v26  ;;  %v1468_v26 = vld [vmem:[%s2109_s10 + $0x48] sm:$0xff] }
 0x3e1   :  { %1301 = vmatpush.msrb.mxu3 %v1268_v51 }
 0x3e2   :  { %1588 = vmatmul.msk.f32.vlgmr.msra.gmra.mxu2 %vm981_vm3, %v1586_v23 }
 0x3e3   :  { %1432 = vmatpush.msra.mxu2 %v1411_v27  ;;  %1302 = vmatpush.msrb.mxu3 %v1267_v54  ;;  %v1467_v27 = vld [vmem:[%s2109_s10 + $0x40] sm:$0xff] }
 0x3e5   :  { %1433 = vmatpush.msra.mxu2 %v1410_v29  ;;  %1303 = vmatpush.msrb.mxu3 %v1266_v57 }
 0x3e6   :  { %v1079_v34 = vpop.f32.mrf.mxu3 }
 0x3e7   :  { %1151 = vmatmul.f32.vlgmr.msra.gmra.mxu1 %v1079_v34  ;;  %1434 = vmatpush.msra.mxu2 %v1409_v32 }
 0x3e8   :  { %1354 = vmatpush.msra.mxu1 %v2022_v13  ;;  %v1393_v13 = vld [vmem:[#allocation5 + $0x368] sm:$0xff]  ;;  %1304 = vmatpush.msrb.mxu3 %v1265_v61 }
 0x3e9   :  { %1435 = vmatpush.msra.mxu2 %v1408_v35 }
 0x3ea   :  { %1591 = vmatmul.msk.f32.vlgmr.msrb.gmra.mxu2 %vm981_vm3, %v1589_v36  ;;  %1305 = vmatpush.msrb.mxu3 %v1264_v63 }
 0x3eb   :  { %1436 = vmatpush.msra.mxu2 %v1407_v37  ;;  %v1464_v37 = vld [vmem:[%s2109_s10 + $0x28] sm:$0xff] }
 0x3ec   :  { %1306 = vmatpush.msrb.mxu3 %v1263_v2 }
 0x3ed   :  { %1437 = vmatpush.msra.mxu2 %v1406_v38  ;;  %v1463_v38 = vld [vmem:[%s2109_s10 + $0x20] sm:$0xff] }
 0x3ee   :  { %1307 = vmatpush.msrb.mxu3 %v1262_v6 }
 0x3ef   :  { %1587 = vmatmul.msk.f32.vlgmr.msrb.gmra.mxu1 %vm981_vm3, %v1586_v23  ;;  %1438 = vmatpush.msra.mxu2 %v1405_v40  ;;  %v1470_v23 = vld [vmem:[%s2109_s10 + $0x58] sm:$0xff]  ;;  %v1461_v40 = vld [vmem:[%s2109_s10 + $0x10] sm:$0xff] }
 0x3f0   :  { %1412 = vmatpush.msrb.mxu1 %v1395_v39  ;;  %1308 = vmatpush.msrb.mxu3 %v1261_v10  ;;  %v1462_v39 = vld [vmem:[%s2109_s10 + $0x18] sm:$0xff] }
 0x3f1   :  { %1439 = vmatpush.msra.mxu2 %v1404_v53 }
 0x3f2   :  { %1413 = vmatpush.msrb.mxu1 %v1394_v42  ;;  %1479 = vmatpush.msra.mxu3 %v1474_v19  ;;  %v1460_v42 = vld [vmem:[%s2109_s10 + $0x8] sm:$0xff] }
 0x3f3   :  { %1440 = vmatpush.msra.mxu2 %v1403_v56 }
 0x3f4   :  { %1414 = vmatpush.msrb.mxu1 %v1393_v13  ;;  %1480 = vmatpush.msra.mxu3 %v1473_v20  ;;  %v1459_v13 = vld [vmem:[%s2109_s10] sm:$0xff] }
 0x3f5   :  { %1441 = vmatpush.msra.mxu2 %v1402_v58  ;;  %v1600_v58 = vld [vmem:[%s2110_s11] ss:$0 sm:$0xff] }
 0x3f6   :  { %1415 = vmatpush.msrb.mxu1 %v1392_v43  ;;  %1481 = vmatpush.msra.mxu3 %v1472_v21 }
 0x3f7   :  { %1590 = vmatmul.msk.f32.vlgmr.msra.gmra.mxu1 %vm981_vm3, %v1589_v36  ;;  %1442 = vmatpush.msra.mxu2 %v1401_v33 }
 0x3f8   :  { %1416 = vmatpush.msrb.mxu1 %v1391_v52  ;;  %1482 = vmatpush.msra.mxu3 %v1471_v22 }
 0x3f9   :  { %1443 = vmatpush.msra.mxu2 %v1400_v1 }
 0x3fa   :  { %1417 = vmatpush.msrb.mxu1 %v1390_v55  ;;  %1483 = vmatpush.msra.mxu3 %v1470_v23  ;;  %v1599_v55 = vld [vmem:[%s2108_s9] ss:$0 sm:$0xff] }
 0x3fb   :  { %1444 = vmatpush.msra.mxu2 %v1399_v5 }
 0x3fc   :  { %1418 = vmatpush.msrb.mxu1 %v1389_v41  ;;  %1484 = vmatpush.msra.mxu3 %v1469_v24 }
 0x3fd   :  { %1445 = vmatpush.msra.mxu2 %v1398_v8 }
 0x3fe   :  { %1419 = vmatpush.msrb.mxu1 %v1388_v30  ;;  %1485 = vmatpush.msra.mxu3 %v1468_v26 }
 0x3ff   :  { %1446 = vmatpush.msra.mxu2 %v1397_v12 }
 0x400   :  { %1420 = vmatpush.msrb.mxu1 %v1387_v0  ;;  %1486 = vmatpush.msra.mxu3 %v1467_v27 }
 0x401   :  { %1447 = vmatpush.msra.mxu2 %v1396_v15 }
 0x402   :  { %1421 = vmatpush.msrb.mxu1 %v1386_v4  ;;  %1487 = vmatpush.msra.mxu3 %v1466_v28 }
 0x404   :  { %1422 = vmatpush.msrb.mxu1 %v1385_v7  ;;  %1488 = vmatpush.msra.mxu3 %v1465_v31 }
 0x406   :  { %1423 = vmatpush.msrb.mxu1 %v1384_v11  ;;  %1489 = vmatpush.msra.mxu3 %v1464_v37 }
 0x408   :  { %1424 = vmatpush.msrb.mxu1 %v1383_v14  ;;  %1490 = vmatpush.msra.mxu3 %v1463_v38 }
 0x40a   :  { %1425 = vmatpush.msrb.mxu1 %v1382_v16  ;;  %1491 = vmatpush.msra.mxu3 %v1462_v39 }
 0x40c   :  { %1426 = vmatpush.msrb.mxu1 %v1381_v17  ;;  %1492 = vmatpush.msra.mxu3 %v1461_v40 }
 0x40e   :  { %1427 = vmatpush.msrb.mxu1 %v1380_v18  ;;  %1493 = vmatpush.msra.mxu3 %v1460_v42 }
 0x410   :  { %1494 = vmatpush.msra.mxu3 %v1459_v13 }
 0x45d   :  { %v1172_v25 = vpop.f32.mrf.mxu2  ;;  %v1212_v45 = vpop.f32.mrf.mxu0 }
 0x463   :  { %v1192_v43 = vpop.f32.mrf.mxu3 }
 0x464   :  { %v1152_v3 = vpop.f32.mrf.mxu1 }
 0x465   :  { %v1173_v29 = vadd.f32 %v1172_v25, %v1152_v3  ;;  %v1257_v32 = vpop.f32.mrf.mxu2 }
 0x466   :  { %1329 = vmatmul.f32.vlgmr.msrb.gmra.mxu0 %v1257_v32 }
 0x467   :  { %v1193_v46 = vadd.f32 %v1192_v43, %v1173_v29 }
 0x469   :  { %v1213_v49 = vadd.f32 %v1212_v45, %v1193_v46 }
 0x46c   :  { %v1237_v34 = vpop.f32.mrf.mxu1 }
 0x46d   :  { %1309 = vmatmul.f32.vlgmr.msrb.gmra.mxu3 %v1237_v34  ;;  %v1376_v35 = vpop.f32.mrf.mxu2 }
 0x46e   :  { %1448 = vmatmul.f32.vlgmr.msra.gmra.mxu2 %v1376_v35 }
 0x474   :  { %v1356_v36 = vpop.f32.mrf.mxu1 }
 0x475   :  { %1428 = vmatmul.f32.vlgmr.msrb.gmra.mxu1 %v1356_v36 }
 0x4e3   :  { %v1330_v48 = vpop.f32.mrf.mxu0 }
 0x4f0   :  { %v1310_v47 = vpop.f32.mrf.mxu3 }
 0x4f1   :  { %v1331_v50 = vadd.f32 %v1330_v48, %v1310_v47  ;;  %v1449_v52 = vpop.f32.mrf.mxu2 }
 0x4f2   :  { %v1429_v51 = vpop.f32.mrf.mxu1 }
 0x4f3   :  { %v1333_v53 = vadd.f32 %v1331_v50, %v1213_v49  ;;  %v1450_v54 = vadd.f32 %v1449_v52, %v1429_v51 }
 0x4f5   :  { %v1452_v56 = vadd.f32 %v1450_v54, %v1333_v53 }
 0x4f7   :  { %v1457_v57 = vadd.f32 %v1599_v55, %v1452_v56 }
 0x4f9   :  { %v1458_v41 = vmax.f32 %v1457_v57, 0.0 }
 0x4fb   :  { %1495 = vmatmul.f32.vlgmr.msra.gmra.mxu3 %v1458_v41 }
 0x57e   :  { %v1496_v44 = vpop.f32.mrf.mxu3 }
 0x57f   :  { %v1497_v59 = vadd.f32 %v1600_v58, %v1496_v44 }
 0x581   :  { %1500 = vst.msk [vmem:[#allocation7] sm:$0x3] %vm1499_vm4, %v1497_v59 }
 0x582   :  { %1511 = dma.vmem_to_hbm [thread:$0]  %s1507_s2, 32, %s1509_s25, [#allocation4]  }
 0x583   :  { %1677 = dma.done.wait [#allocation4], 32  }
 0x584   :  { %1678 = vsyncadd [#allocation4], 4294967264 }
 0x585   :  { %1516 = vsyncpa [#allocation3], 1 }
 0x586   :  { %1517 = vsyncpa [#allocation6], 1 }
 0x587   :  { %1518 = vsyncpa [#allocation4], 1 }

</bundles_post_ra>
